<compile_context>
chip_gen: v5e
topology: v5e:2x2
jax: 0.10.0
libtpu: 0.0.40
codegen_flags: <defaults>
</compile_context>

<pallas_src>
import functools

import jax
import jax.numpy as jnp
from jax import lax
from jax.experimental import pallas as pl
from jax.experimental.pallas import tpu as pltpu

_NEG = -1e30                      # finite "minus inf": avoids exp(-inf - -inf) NaNs
_VMEM_LIMIT = 32 * 1024 * 1024    # explicit scoped VMEM budget (safe on v5e/v6e/v7x)


def _tile(n, target):
    """Largest divisor of n that is <= target (prefer multiples of 8)."""
    t = min(n, target)
    if t == n:
        return t
    for cand in range(t - t % 8, 0, -8):
        if n % cand == 0:
            return cand
    while n % t:
        t -= 1
    return t


# --------------------- fused projection (+ RoPE) kernels --------------------- #

def _proj_kernel(x_ref, w_ref, b_ref, o_ref, acc_ref):
    """One (batch, head, seq-block) tile of y = x @ w_h + b_h; K tiled on the grid."""
    k = pl.program_id(3)

    @pl.when(k == 0)
    def _init():
        acc_ref[...] = jnp.zeros(acc_ref.shape, jnp.float32)

    acc_ref[...] += jnp.dot(x_ref[0], w_ref[0], preferred_element_type=jnp.float32)

    @pl.when(k == pl.num_programs(3) - 1)
    def _store():
        o_ref[0, 0] = (acc_ref[...] + b_ref[0]).astype(o_ref.dtype)


def _proj_rope_kernel(x_ref, w_ref, b_ref, cos_ref, sin_ref, o_ref, acc_ref):
    """Same as _proj_kernel but applies rotate-half RoPE in the epilogue."""
    k = pl.program_id(3)

    @pl.when(k == 0)
    def _init():
        acc_ref[...] = jnp.zeros(acc_ref.shape, jnp.float32)

    acc_ref[...] += jnp.dot(x_ref[0], w_ref[0], preferred_element_type=jnp.float32)

    @pl.when(k == pl.num_programs(3) - 1)
    def _store():
        y = acc_ref[...] + b_ref[0]                        # (ts, D), f32
        half = y.shape[-1] // 2
        y_rot = jnp.concatenate([y[:, half:], y[:, :half]], axis=-1)
        o_ref[0, 0] = (y * cos_ref[...] + y_rot * sin_ref[...]).astype(o_ref.dtype)


def project_heads(x, w_heads, b_heads, cos=None, sin=None, *, ts, tk):
    """x: (B,S,K); w_heads: (H,K,D); b_heads: (H,D) -> (B,H,S,D), RoPE fused if cos given."""
    B, S, K = x.shape
    H, _, D = w_heads.shape
    grid = (B, H, S // ts, K // tk)

    in_specs = [
        pl.BlockSpec((1, ts, tk), lambda b, h, s, k: (b, s, k)),
        pl.BlockSpec((1, tk, D), lambda b, h, s, k: (h, k, 0)),
        pl.BlockSpec((1, 1, D), lambda b, h, s, k: (h, 0, 0)),
    ]
    args = [x, w_heads, b_heads.reshape(H, 1, D)]
    if cos is not None:
        in_specs += [pl.BlockSpec((ts, D), lambda b, h, s, k: (s, 0)),
                     pl.BlockSpec((ts, D), lambda b, h, s, k: (s, 0))]
        args += [cos, sin]
        kernel = _proj_rope_kernel
    else:
        kernel = _proj_kernel

    return pl.pallas_call(
        kernel,
        grid=grid,
        in_specs=in_specs,
        out_specs=pl.BlockSpec((1, 1, ts, D), lambda b, h, s, k: (b, h, s, 0)),
        out_shape=jax.ShapeDtypeStruct((B, H, S, D), x.dtype),
        scratch_shapes=[pltpu.VMEM((ts, D), jnp.float32)],
        compiler_params=pltpu.CompilerParams(
            dimension_semantics=("parallel", "parallel", "parallel", "arbitrary"),
            vmem_limit_bytes=_VMEM_LIMIT),
    )(*args)


# ------------------------ flash causal GQA attention ------------------------ #

def _flash_attn_kernel(q_ref, k_ref, v_ref, o_ref, m_sc, l_sc, acc_sc, *, scale):
    qi = pl.program_id(3)
    kvi = pl.program_id(4)

    @pl.when(kvi == 0)
    def _init():
        m_sc[...] = jnp.full(m_sc.shape, _NEG, jnp.float32)
        l_sc[...] = jnp.zeros(l_sc.shape, jnp.float32)
        acc_sc[...] = jnp.zeros(acc_sc.shape, jnp.float32)

    # Causal: KV blocks strictly above the diagonal contribute nothing -> skip.
    @pl.when(kvi <= qi)
    def _compute():
        q = q_ref[0, 0]
        q = q * jnp.asarray(scale, q.dtype)         # fold scale into q (SxD, not SxS)
        k = k_ref[0, 0]
        v = v_ref[0, 0]
        # Contract last dims of both operands: no explicit k.T relayout.
        s = lax.dot_general(q, k, (((1,), (1,)), ((), ())),
                            preferred_element_type=jnp.float32)        # (tq, tkv)
        tq, tkv = s.shape
        row = lax.broadcasted_iota(jnp.int32, (tq, tkv), 0)
        col = lax.broadcasted_iota(jnp.int32, (tq, tkv), 1)
        # Mask only matters on the diagonal block (tq == tkv, aligned offsets).
        s = jnp.where((kvi < qi) | (col <= row), s, _NEG)

        m_prev = m_sc[...]
        m_new = jnp.maximum(m_prev, jnp.max(s, axis=-1, keepdims=True))
        alpha = jnp.exp(m_prev - m_new)
        p = jnp.exp(s - m_new)
        l_sc[...] = alpha * l_sc[...] + jnp.sum(p, axis=-1, keepdims=True)
        acc_sc[...] = alpha * acc_sc[...] + jnp.dot(
            p.astype(v.dtype), v, preferred_element_type=jnp.float32)
        m_sc[...] = m_new

    # The diagonal block is the last contributing KV block for this q block.
    @pl.when(kvi == qi)
    def _finalize():
        inv = pl.reciprocal(l_sc[...], approx=True)   # EUP slot; VALU stays free
        o_ref[0, 0] = (acc_sc[...] * inv).astype(o_ref.dtype)


def gqa_causal_attention(q, k, v, group, *, tq):
    """q: (B, Hq, S, D); k, v: (B, Hkv, S, D) -> (B, Hq, S, D)."""
    B, Hq, S, D = q.shape
    Hkv = k.shape[1]
    nblk = S // tq
    scale = 1.0 / (D ** 0.5)
    kernel = functools.partial(_flash_attn_kernel, scale=scale)

    q_map = lambda b, hk, g, qi, ki: (b, hk * group + g, qi, 0)
    # Clamp above-diagonal KV block indices to the diagonal so the pipeline
    # re-uses the resident block instead of DMA-ing fully-masked tiles.
    kv_map = lambda b, hk, g, qi, ki: (b, hk, jnp.minimum(ki, qi), 0)

    return pl.pallas_call(
        kernel,
        grid=(B, Hkv, group, nblk, nblk),
        in_specs=[
            pl.BlockSpec((1, 1, tq, D), q_map),
            pl.BlockSpec((1, 1, tq, D), kv_map),
            pl.BlockSpec((1, 1, tq, D), kv_map),
        ],
        out_specs=pl.BlockSpec((1, 1, tq, D), q_map),
        out_shape=jax.ShapeDtypeStruct((B, Hq, S, D), q.dtype),
        scratch_shapes=[
            pltpu.VMEM((tq, 1), jnp.float32),    # running max
            pltpu.VMEM((tq, 1), jnp.float32),    # running denominator
            pltpu.VMEM((tq, D), jnp.float32),    # running accumulator
        ],
        compiler_params=pltpu.CompilerParams(
            dimension_semantics=("parallel", "parallel", "parallel", "parallel", "arbitrary"),
            vmem_limit_bytes=_VMEM_LIMIT),
    )(q, k, v)


# ----------------------- output projection (no bias) ------------------------ #

def _oproj_kernel(a_ref, w_ref, o_ref, acc_ref):
    """out[b, s, :] = sum_h attn[b, h, s, :] @ wo[h]; heads contracted on the grid."""
    h = pl.program_id(3)

    @pl.when(h == 0)
    def _init():
        acc_ref[...] = jnp.zeros(acc_ref.shape, jnp.float32)

    acc_ref[...] += jnp.dot(a_ref[0, 0], w_ref[0], preferred_element_type=jnp.float32)

    @pl.when(h == pl.num_programs(3) - 1)
    def _store():
        o_ref[0] = acc_ref[...].astype(o_ref.dtype)       # o_proj has bias=False

def output_projection(attn, wo_heads, *, ts, tn):
    """attn: (B, H, S, D) head-major; wo_heads: (H, D, N) -> (B, S, N)."""
    B, H, S, D = attn.shape
    N = wo_heads.shape[-1]
    return pl.pallas_call(
        _oproj_kernel,
        grid=(B, S // ts, N // tn, H),
        in_specs=[
            pl.BlockSpec((1, 1, ts, D), lambda b, s, n, h: (b, h, s, 0)),
            pl.BlockSpec((1, D, tn), lambda b, s, n, h: (h, 0, n)),
        ],
        out_specs=pl.BlockSpec((1, ts, tn), lambda b, s, n, h: (b, s, n)),
        out_shape=jax.ShapeDtypeStruct((B, S, N), attn.dtype),
        scratch_shapes=[pltpu.VMEM((ts, tn), jnp.float32)],
        compiler_params=pltpu.CompilerParams(
            dimension_semantics=("parallel", "parallel", "parallel", "arbitrary"),
            vmem_limit_bytes=_VMEM_LIMIT),
    )(attn, wo_heads)


# ------------------------------ weight prep --------------------------------- #

def _per_head_deinterleaved(w, b, n_heads, head_size):
    """(K, H*D)/(H*D,) -> (H, K, D)/(H, D) with each head's columns permuted
    from interleaved pairs to [evens..., odds...] order (RoPE rotate-half form)."""
    K = w.shape[0]
    w = w.reshape(K, n_heads, head_size // 2, 2).transpose(0, 1, 3, 2)
    w = w.reshape(K, n_heads, head_size).transpose(1, 0, 2)
    b = b.reshape(n_heads, head_size // 2, 2).transpose(0, 2, 1).reshape(n_heads, head_size)
    return w, b


def _per_head(w, b, n_heads, head_size):
    K = w.shape[0]
    return (w.reshape(K, n_heads, head_size).transpose(1, 0, 2),
            b.reshape(n_heads, head_size))


# -------------------------------- forward ----------------------------------- #

def skyer_sdpa_attention(params, x, cos, sin, start_pos, n_q_heads, n_kv_heads):
    B, S, input_dim = x.shape
    hide_dim = params["wq"].shape[1]
    head_size = hide_dim // n_q_heads
    group = n_q_heads // n_kv_heads

    # Shape-adaptive tiles (for real LLM shapes these land at 256/512-ish and fit
    # the 64 MiB v7x VMEM budget with double-buffering).
    ts = _tile(S, 256)
    tk = _tile(input_dim, 512)
    tq = _tile(S, 256)
    tn = _tile(input_dim, 256)

    # Per-head weights; q/k columns de-interleaved so RoPE becomes rotate-half.
    # (In a real model these transforms are done once at weight-load time.)
    wq_h, bq_h = _per_head_deinterleaved(params["wq"], params["bq"], n_q_heads, head_size)
    wk_h, bk_h = _per_head_deinterleaved(params["wk"], params["bk"], n_kv_heads, head_size)
    wv_h, bv_h = _per_head(params["wv"], params["bv"], n_kv_heads, head_size)
    wo_h = params["wo"].reshape(n_q_heads, head_size, input_dim)

    # Rotary tables for the current window, expanded to (S, head_size) in the
    # rotate-half convention matching the de-interleaved head layout.
    cos_s = lax.dynamic_slice_in_dim(cos, start_pos, S, axis=0)
    sin_s = lax.dynamic_slice_in_dim(sin, start_pos, S, axis=0)
    cos_cat = jnp.concatenate([cos_s, cos_s], axis=-1).astype(jnp.float32)
    sin_cat = jnp.concatenate([-sin_s, sin_s], axis=-1).astype(jnp.float32)

    # Fused projection + RoPE, written directly in (B, H, S, D) layout.
    q = project_heads(x, wq_h, bq_h, cos_cat, sin_cat, ts=ts, tk=tk)
    k = project_heads(x, wk_h, bk_h, cos_cat, sin_cat, ts=ts, tk=tk)
    v = project_heads(x, wv_h, bv_h, ts=ts, tk=tk)

    # Flash-style causal GQA attention.
    o = gqa_causal_attention(q, k, v, group, tq=tq)       # (B, Hq, S, D)

    # Output projection (heads contracted on the grid; no transpose, no bias).
    return output_projection(o, wo_h, ts=ts, tn=tn)       # (B, S, input_dim)


# --------------------------- pure-JAX reference ------------------------------ #

def apply_rotary_emb_interleaved(x, cos, sin):
    B, S, H, D = x.shape
    xr = x.astype(jnp.float32).reshape(B, S, H, D // 2, 2)
    x0, x1 = xr[..., 0], xr[..., 1]
    c = cos[None, :, None, :]
    s = sin[None, :, None, :]
    o0 = x0 * c - x1 * s
    o1 = x0 * s + x1 * c
    return jnp.stack([o0, o1], axis=-1).reshape(B, S, H, D).astype(x.dtype)


def reference_forward(params, x, cos, sin, start_pos, n_q_heads, n_kv_heads):
    B, S, input_dim = x.shape
    hide_dim = params["wq"].shape[1]
    head_size = hide_dim // n_q_heads
    group = n_q_heads // n_kv_heads

    q = (x @ params["wq"] + params["bq"]).reshape(B, S, n_q_heads, head_size)
    k = (x @ params["wk"] + params["bk"]).reshape(B, S, n_kv_heads, head_size)
    v = (x @ params["wv"] + params["bv"]).reshape(B, S, n_kv_heads, head_size)

    cos_s = cos[start_pos:start_pos + S]
    sin_s = sin[start_pos:start_pos + S]
    q = apply_rotary_emb_interleaved(q, cos_s, sin_s)
    k = apply_rotary_emb_interleaved(k, cos_s, sin_s)

    qh = q.transpose(0, 2, 1, 3)
    kh = jnp.repeat(k.transpose(0, 2, 1, 3), group, axis=1)
    vh = jnp.repeat(v.transpose(0, 2, 1, 3), group, axis=1)

    scale = 1.0 / (head_size ** 0.5)
    s = jnp.einsum("bhqd,bhkd->bhqk", qh, kh) * scale
    mask = jnp.tril(jnp.ones((S, S), dtype=bool))
    s = jnp.where(mask[None, None], s, -jnp.inf)
    p = jax.nn.softmax(s, axis=-1)
    o = jnp.einsum("bhqk,bhkd->bhqd", p, vh)
    o = o.transpose(0, 2, 1, 3).reshape(B, S, n_q_heads * head_size)
    return o @ params["wo"]


# ---------------------------------- main ------------------------------------- #

if __name__ == "__main__":
    B, S = 2, 8
    input_dim, hide_dim = 32, 32
    n_q_heads, n_kv_heads = 4, 2
    head_size = hide_dim // n_q_heads          # 8
    max_seq = 16
    start_pos = 2

    key = jax.random.PRNGKey(0)
    k_x, k_q, k_k, k_v, k_o, k_bq, k_bk, k_bv = jax.random.split(key, 8)

    x = jax.random.normal(k_x, (B, S, input_dim), dtype=jnp.float32)

    def init_w(k, shape):
        return 0.02 * jax.random.normal(k, shape, dtype=jnp.float32)

    # Weights stored pre-transposed as (in_features, out_features).
    params = {
        "wq": init_w(k_q, (input_dim, head_size * n_q_heads)),
        "wk": init_w(k_k, (input_dim, head_size * n_kv_heads)),
        "wv": init_w(k_v, (input_dim, head_size * n_kv_heads)),
        "wo": init_w(k_o, (hide_dim, input_dim)),
        "bq": 0.02 * jax.random.normal(k_bq, (head_size * n_q_heads,), dtype=jnp.float32),
        "bk": 0.02 * jax.random.normal(k_bk, (head_size * n_kv_heads,), dtype=jnp.float32),
        "bv": 0.02 * jax.random.normal(k_bv, (head_size * n_kv_heads,), dtype=jnp.float32),
    }

    # Rotary frequency table (cos/sin of freqs_cis), theta=10000 (LLaMA convention).
    inv_freq = 1.0 / (10000.0 ** (jnp.arange(0, head_size, 2, dtype=jnp.float32) / head_size))
    t = jnp.arange(max_seq, dtype=jnp.float32)
    angles = jnp.outer(t, inv_freq)            # (max_seq, head_size // 2)
    cos, sin = jnp.cos(angles), jnp.sin(angles)

    fwd = jax.jit(functools.partial(
        skyer_sdpa_attention,
        start_pos=start_pos, n_q_heads=n_q_heads, n_kv_heads=n_kv_heads))
    out = jax.block_until_ready(fwd(params, x, cos, sin))

    ref = reference_forward(params, x, cos, sin, start_pos, n_q_heads, n_kv_heads)
    assert out.shape == (B, S, input_dim)
    # Slightly looser tolerance: attention epilogue uses the EUP approximate reciprocal.
    assert jnp.allclose(out, ref, atol=3e-4, rtol=3e-2), "mismatch vs reference"

    print("KERNEL_OK")
</pallas_src>

<mosaic_0001>
module attributes {stable_mosaic.version = 11 : i64} {
  func.func @_proj_rope_kernel(%arg0: i32, %arg1: i32, %arg2: i32, %arg3: i32, %arg4: memref<1x8x32xf32, #tpu.memory_space<vmem>>, %arg5: memref<1x32x8xf32, #tpu.memory_space<vmem>>, %arg6: memref<1x1x8xf32, #tpu.memory_space<vmem>>, %arg7: memref<8x8xf32, #tpu.memory_space<vmem>>, %arg8: memref<8x8xf32, #tpu.memory_space<vmem>>, %arg9: memref<1x1x8x8xf32, #tpu.memory_space<vmem>>, %arg10: memref<8x8xf32, #tpu.memory_space<vmem>>) attributes {dimension_semantics = [#tpu.dimension_semantics<parallel>, #tpu.dimension_semantics<parallel>, #tpu.dimension_semantics<parallel>, #tpu.dimension_semantics<arbitrary>], iteration_bounds = array<i64: 2, 2, 1, 1>, scalar_prefetch = 0 : i64, scratch_operands = 1 : i64, tpu.core_type = #tpu.core_type<tc>, window_params = [{transform_indices = @transform_0, window_bounds = array<i64: 1, 8, 32>}, {transform_indices = @transform_1, window_bounds = array<i64: 1, 32, 8>}, {transform_indices = @transform_2, window_bounds = array<i64: 1, 1, 8>}, {transform_indices = @transform_3, window_bounds = array<i64: 8, 8>}, {transform_indices = @transform_4, window_bounds = array<i64: 8, 8>}, {transform_indices = @transform_5, window_bounds = array<i64: 1, 1, 8, 8>}]} {
    %c0_i32 = arith.constant 0 : i32
    %0 = arith.cmpi eq, %arg3, %c0_i32 : i32
    %1 = arith.extui %0 : i1 to i32
    %c0_i32_0 = arith.constant 0 : i32
    %2 = arith.cmpi ne, %1, %c0_i32_0 : i32
    scf.if %2 {
      %cst_12 = arith.constant 0.000000e+00 : f32
      %14 = vector.broadcast %cst_12 : f32 to vector<8x8xf32>
      %c0_13 = arith.constant 0 : index
      %c0_14 = arith.constant 0 : index
      %15 = vector.load %arg10[%c0_13, %c0_14] : memref<8x8xf32, #tpu.memory_space<vmem>>, vector<8x8xf32>
      tpu.vector_store %arg10[%c0_13, %c0_14], %14 {strides = array<i32>} : memref<8x8xf32, #tpu.memory_space<vmem>>, vector<8x8xf32>,
    } else {
    }
    %c0 = arith.constant 0 : index
    %c0_1 = arith.constant 0 : index
    %3 = vector.load %arg10[%c0, %c0_1] : memref<8x8xf32, #tpu.memory_space<vmem>>, vector<8x8xf32>
    %c0_2 = arith.constant 0 : index
    %c0_3 = arith.constant 0 : index
    %c0_4 = arith.constant 0 : index
    %4 = vector.load %arg4[%c0_2, %c0_3, %c0_4] : memref<1x8x32xf32, #tpu.memory_space<vmem>>, vector<1x8x32xf32>
    %5 = vector.shape_cast %4 : vector<1x8x32xf32> to vector<8x32xf32>
    %c0_5 = arith.constant 0 : index
    %c0_6 = arith.constant 0 : index
    %c0_7 = arith.constant 0 : index
    %6 = vector.load %arg5[%c0_5, %c0_6, %c0_7] : memref<1x32x8xf32, #tpu.memory_space<vmem>>, vector<1x32x8xf32>
    %7 = vector.shape_cast %6 : vector<1x32x8xf32> to vector<32x8xf32>
    %cst = arith.constant dense<0.000000e+00> : vector<8x8xf32>
    %8 = tpu.matmul %5, %7, %cst {dimension_numbers = #tpu.dot_dimension_numbers<[1], [0], [0], [1], [0, 0, 1, 1], [], []>} : vector<8x32xf32>, vector<32x8xf32>, vector<8x8xf32> -> vector<8x8xf32>
    %9 = arith.addf %3, %8 : vector<8x8xf32>
    %c0_8 = arith.constant 0 : index
    %c0_9 = arith.constant 0 : index
    %10 = vector.load %arg10[%c0_8, %c0_9] : memref<8x8xf32, #tpu.memory_space<vmem>>, vector<8x8xf32>
    tpu.vector_store %arg10[%c0_8, %c0_9], %9 {strides = array<i32>} : memref<8x8xf32, #tpu.memory_space<vmem>>, vector<8x8xf32>,
    %c0_i32_10 = arith.constant 0 : i32
    %11 = arith.cmpi eq, %arg3, %c0_i32_10 : i32
    %12 = arith.extui %11 : i1 to i32
    %c0_i32_11 = arith.constant 0 : i32
    %13 = arith.cmpi ne, %12, %c0_i32_11 : i32
    scf.if %13 {
      %c0_12 = arith.constant 0 : index
      %c0_13 = arith.constant 0 : index
      %14 = vector.load %arg10[%c0_12, %c0_13] : memref<8x8xf32, #tpu.memory_space<vmem>>, vector<8x8xf32>
      %c0_14 = arith.constant 0 : index
      %c0_15 = arith.constant 0 : index
      %c0_16 = arith.constant 0 : index
      %15 = vector.load %arg6[%c0_14, %c0_15, %c0_16] : memref<1x1x8xf32, #tpu.memory_space<vmem>>, vector<1x1x8xf32>
      %16 = vector.shape_cast %15 : vector<1x1x8xf32> to vector<1x8xf32>
      %17 = vector.broadcast %16 : vector<1x8xf32> to vector<8x8xf32>
      %18 = arith.addf %14, %17 : vector<8x8xf32>
      %19 = vector.extract_strided_slice %18 {offsets = [0, 4], sizes = [8, 4], strides = [1, 1]} : vector<8x8xf32> to vector<8x4xf32>
      %20 = vector.extract_strided_slice %18 {offsets = [0, 0], sizes = [8, 4], strides = [1, 1]} : vector<8x8xf32> to vector<8x4xf32>
      %21 = tpu.concatenate %19, %20 in 1 : vector<8x4xf32>, vector<8x4xf32> -> vector<8x8xf32>
      %c0_17 = arith.constant 0 : index
      %c0_18 = arith.constant 0 : index
      %22 = vector.load %arg7[%c0_17, %c0_18] : memref<8x8xf32, #tpu.memory_space<vmem>>, vector<8x8xf32>
      %23 = arith.mulf %18, %22 : vector<8x8xf32>
      %c0_19 = arith.constant 0 : index
      %c0_20 = arith.constant 0 : index
      %24 = vector.load %arg8[%c0_19, %c0_20] : memref<8x8xf32, #tpu.memory_space<vmem>>, vector<8x8xf32>
      %25 = arith.mulf %21, %24 : vector<8x8xf32>
      %26 = arith.addf %23, %25 : vector<8x8xf32>
      %c0_21 = arith.constant 0 : index
      %c0_22 = arith.constant 0 : index
      %c0_23 = arith.constant 0 : index
      %c0_24 = arith.constant 0 : index
      %27 = vector.load %arg9[%c0_21, %c0_22, %c0_23, %c0_24] : memref<1x1x8x8xf32, #tpu.memory_space<vmem>>, vector<1x1x8x8xf32>
      %28 = vector.shape_cast %27 : vector<1x1x8x8xf32> to vector<8x8xf32>
      %29 = vector.shape_cast %26 : vector<8x8xf32> to vector<1x1x8x8xf32>
      tpu.vector_store %arg9[%c0_21, %c0_22, %c0_23, %c0_24], %29 {strides = array<i32>} : memref<1x1x8x8xf32, #tpu.memory_space<vmem>>, vector<1x1x8x8xf32>,
    } else {
    }
    return
  }
  func.func @transform_0(%arg0: i32, %arg1: i32, %arg2: i32, %arg3: i32) -> (i32, i32, i32) {
    %c0_i32 = arith.constant 0 : i32
    return %arg0, %arg2, %arg3 : i32, i32, i32
  }
  func.func @transform_1(%arg0: i32, %arg1: i32, %arg2: i32, %arg3: i32) -> (i32, i32, i32) {
    %c0_i32 = arith.constant 0 : i32
    %c0_i32_0 = arith.constant 0 : i32
    return %arg1, %arg3, %c0_i32 : i32, i32, i32
  }
  func.func @transform_2(%arg0: i32, %arg1: i32, %arg2: i32, %arg3: i32) -> (i32, i32, i32) {
    %c0_i32 = arith.constant 0 : i32
    %c0_i32_0 = arith.constant 0 : i32
    %c0_i32_1 = arith.constant 0 : i32
    return %arg1, %c0_i32, %c0_i32_0 : i32, i32, i32
  }
  func.func @transform_3(%arg0: i32, %arg1: i32, %arg2: i32, %arg3: i32) -> (i32, i32) {
    %c0_i32 = arith.constant 0 : i32
    %c0_i32_0 = arith.constant 0 : i32
    return %arg2, %c0_i32 : i32, i32
  }
  func.func @transform_4(%arg0: i32, %arg1: i32, %arg2: i32, %arg3: i32) -> (i32, i32) {
    %c0_i32 = arith.constant 0 : i32
    %c0_i32_0 = arith.constant 0 : i32
    return %arg2, %c0_i32 : i32, i32
  }
  func.func @transform_5(%arg0: i32, %arg1: i32, %arg2: i32, %arg3: i32) -> (i32, i32, i32, i32) {
    %c0_i32 = arith.constant 0 : i32
    %c0_i32_0 = arith.constant 0 : i32
    return %arg0, %arg1, %arg2, %c0_i32 : i32, i32, i32, i32
  }
}

module attributes {stable_mosaic.version = 11 : i64} {
  func.func @_proj_rope_kernel(%arg0: i32, %arg1: i32, %arg2: i32, %arg3: i32, %arg4: memref<1x8x32xf32, #tpu.memory_space<vmem>>, %arg5: memref<1x32x8xf32, #tpu.memory_space<vmem>>, %arg6: memref<1x1x8xf32, #tpu.memory_space<vmem>>, %arg7: memref<8x8xf32, #tpu.memory_space<vmem>>, %arg8: memref<8x8xf32, #tpu.memory_space<vmem>>, %arg9: memref<1x1x8x8xf32, #tpu.memory_space<vmem>>, %arg10: memref<8x8xf32, #tpu.memory_space<vmem>>) attributes {dimension_semantics = [#tpu.dimension_semantics<parallel>, #tpu.dimension_semantics<parallel>, #tpu.dimension_semantics<parallel>, #tpu.dimension_semantics<arbitrary>], iteration_bounds = array<i64: 2, 4, 1, 1>, scalar_prefetch = 0 : i64, scratch_operands = 1 : i64, tpu.core_type = #tpu.core_type<tc>, window_params = [{transform_indices = @transform_0, window_bounds = array<i64: 1, 8, 32>}, {transform_indices = @transform_1, window_bounds = array<i64: 1, 32, 8>}, {transform_indices = @transform_2, window_bounds = array<i64: 1, 1, 8>}, {transform_indices = @transform_3, window_bounds = array<i64: 8, 8>}, {transform_indices = @transform_4, window_bounds = array<i64: 8, 8>}, {transform_indices = @transform_5, window_bounds = array<i64: 1, 1, 8, 8>}]} {
    %c0_i32 = arith.constant 0 : i32
    %0 = arith.cmpi eq, %arg3, %c0_i32 : i32
    %1 = arith.extui %0 : i1 to i32
    %c0_i32_0 = arith.constant 0 : i32
    %2 = arith.cmpi ne, %1, %c0_i32_0 : i32
    scf.if %2 {
      %cst_12 = arith.constant 0.000000e+00 : f32
      %14 = vector.broadcast %cst_12 : f32 to vector<8x8xf32>
      %c0_13 = arith.constant 0 : index
      %c0_14 = arith.constant 0 : index
      %15 = vector.load %arg10[%c0_13, %c0_14] : memref<8x8xf32, #tpu.memory_space<vmem>>, vector<8x8xf32>
      tpu.vector_store %arg10[%c0_13, %c0_14], %14 {strides = array<i32>} : memref<8x8xf32, #tpu.memory_space<vmem>>, vector<8x8xf32>,
    } else {
    }
    %c0 = arith.constant 0 : index
    %c0_1 = arith.constant 0 : index
    %3 = vector.load %arg10[%c0, %c0_1] : memref<8x8xf32, #tpu.memory_space<vmem>>, vector<8x8xf32>
    %c0_2 = arith.constant 0 : index
    %c0_3 = arith.constant 0 : index
    %c0_4 = arith.constant 0 : index
    %4 = vector.load %arg4[%c0_2, %c0_3, %c0_4] : memref<1x8x32xf32, #tpu.memory_space<vmem>>, vector<1x8x32xf32>
    %5 = vector.shape_cast %4 : vector<1x8x32xf32> to vector<8x32xf32>
    %c0_5 = arith.constant 0 : index
    %c0_6 = arith.constant 0 : index
    %c0_7 = arith.constant 0 : index
    %6 = vector.load %arg5[%c0_5, %c0_6, %c0_7] : memref<1x32x8xf32, #tpu.memory_space<vmem>>, vector<1x32x8xf32>
    %7 = vector.shape_cast %6 : vector<1x32x8xf32> to vector<32x8xf32>
    %cst = arith.constant dense<0.000000e+00> : vector<8x8xf32>
    %8 = tpu.matmul %5, %7, %cst {dimension_numbers = #tpu.dot_dimension_numbers<[1], [0], [0], [1], [0, 0, 1, 1], [], []>} : vector<8x32xf32>, vector<32x8xf32>, vector<8x8xf32> -> vector<8x8xf32>
    %9 = arith.addf %3, %8 : vector<8x8xf32>
    %c0_8 = arith.constant 0 : index
    %c0_9 = arith.constant 0 : index
    %10 = vector.load %arg10[%c0_8, %c0_9] : memref<8x8xf32, #tpu.memory_space<vmem>>, vector<8x8xf32>
    tpu.vector_store %arg10[%c0_8, %c0_9], %9 {strides = array<i32>} : memref<8x8xf32, #tpu.memory_space<vmem>>, vector<8x8xf32>,
    %c0_i32_10 = arith.constant 0 : i32
    %11 = arith.cmpi eq, %arg3, %c0_i32_10 : i32
    %12 = arith.extui %11 : i1 to i32
    %c0_i32_11 = arith.constant 0 : i32
    %13 = arith.cmpi ne, %12, %c0_i32_11 : i32
    scf.if %13 {
      %c0_12 = arith.constant 0 : index
      %c0_13 = arith.constant 0 : index
      %14 = vector.load %arg10[%c0_12, %c0_13] : memref<8x8xf32, #tpu.memory_space<vmem>>, vector<8x8xf32>
      %c0_14 = arith.constant 0 : index
      %c0_15 = arith.constant 0 : index
      %c0_16 = arith.constant 0 : index
      %15 = vector.load %arg6[%c0_14, %c0_15, %c0_16] : memref<1x1x8xf32, #tpu.memory_space<vmem>>, vector<1x1x8xf32>
      %16 = vector.shape_cast %15 : vector<1x1x8xf32> to vector<1x8xf32>
      %17 = vector.broadcast %16 : vector<1x8xf32> to vector<8x8xf32>
      %18 = arith.addf %14, %17 : vector<8x8xf32>
      %19 = vector.extract_strided_slice %18 {offsets = [0, 4], sizes = [8, 4], strides = [1, 1]} : vector<8x8xf32> to vector<8x4xf32>
      %20 = vector.extract_strided_slice %18 {offsets = [0, 0], sizes = [8, 4], strides = [1, 1]} : vector<8x8xf32> to vector<8x4xf32>
      %21 = tpu.concatenate %19, %20 in 1 : vector<8x4xf32>, vector<8x4xf32> -> vector<8x8xf32>
      %c0_17 = arith.constant 0 : index
      %c0_18 = arith.constant 0 : index
      %22 = vector.load %arg7[%c0_17, %c0_18] : memref<8x8xf32, #tpu.memory_space<vmem>>, vector<8x8xf32>
      %23 = arith.mulf %18, %22 : vector<8x8xf32>
      %c0_19 = arith.constant 0 : index
      %c0_20 = arith.constant 0 : index
      %24 = vector.load %arg8[%c0_19, %c0_20] : memref<8x8xf32, #tpu.memory_space<vmem>>, vector<8x8xf32>
      %25 = arith.mulf %21, %24 : vector<8x8xf32>
      %26 = arith.addf %23, %25 : vector<8x8xf32>
      %c0_21 = arith.constant 0 : index
      %c0_22 = arith.constant 0 : index
      %c0_23 = arith.constant 0 : index
      %c0_24 = arith.constant 0 : index
      %27 = vector.load %arg9[%c0_21, %c0_22, %c0_23, %c0_24] : memref<1x1x8x8xf32, #tpu.memory_space<vmem>>, vector<1x1x8x8xf32>
      %28 = vector.shape_cast %27 : vector<1x1x8x8xf32> to vector<8x8xf32>
      %29 = vector.shape_cast %26 : vector<8x8xf32> to vector<1x1x8x8xf32>
      tpu.vector_store %arg9[%c0_21, %c0_22, %c0_23, %c0_24], %29 {strides = array<i32>} : memref<1x1x8x8xf32, #tpu.memory_space<vmem>>, vector<1x1x8x8xf32>,
    } else {
    }
    return
  }
  func.func @transform_0(%arg0: i32, %arg1: i32, %arg2: i32, %arg3: i32) -> (i32, i32, i32) {
    %c0_i32 = arith.constant 0 : i32
    return %arg0, %arg2, %arg3 : i32, i32, i32
  }
  func.func @transform_1(%arg0: i32, %arg1: i32, %arg2: i32, %arg3: i32) -> (i32, i32, i32) {
    %c0_i32 = arith.constant 0 : i32
    %c0_i32_0 = arith.constant 0 : i32
    return %arg1, %arg3, %c0_i32 : i32, i32, i32
  }
  func.func @transform_2(%arg0: i32, %arg1: i32, %arg2: i32, %arg3: i32) -> (i32, i32, i32) {
    %c0_i32 = arith.constant 0 : i32
    %c0_i32_0 = arith.constant 0 : i32
    %c0_i32_1 = arith.constant 0 : i32
    return %arg1, %c0_i32, %c0_i32_0 : i32, i32, i32
  }
  func.func @transform_3(%arg0: i32, %arg1: i32, %arg2: i32, %arg3: i32) -> (i32, i32) {
    %c0_i32 = arith.constant 0 : i32
    %c0_i32_0 = arith.constant 0 : i32
    return %arg2, %c0_i32 : i32, i32
  }
  func.func @transform_4(%arg0: i32, %arg1: i32, %arg2: i32, %arg3: i32) -> (i32, i32) {
    %c0_i32 = arith.constant 0 : i32
    %c0_i32_0 = arith.constant 0 : i32
    return %arg2, %c0_i32 : i32, i32
  }
  func.func @transform_5(%arg0: i32, %arg1: i32, %arg2: i32, %arg3: i32) -> (i32, i32, i32, i32) {
    %c0_i32 = arith.constant 0 : i32
    %c0_i32_0 = arith.constant 0 : i32
    return %arg0, %arg1, %arg2, %c0_i32 : i32, i32, i32, i32
  }
}

module attributes {stable_mosaic.version = 11 : i64} {
  func.func @_proj_kernel(%arg0: i32, %arg1: i32, %arg2: i32, %arg3: i32, %arg4: memref<1x8x32xf32, #tpu.memory_space<vmem>>, %arg5: memref<1x32x8xf32, #tpu.memory_space<vmem>>, %arg6: memref<1x1x8xf32, #tpu.memory_space<vmem>>, %arg7: memref<1x1x8x8xf32, #tpu.memory_space<vmem>>, %arg8: memref<8x8xf32, #tpu.memory_space<vmem>>) attributes {dimension_semantics = [#tpu.dimension_semantics<parallel>, #tpu.dimension_semantics<parallel>, #tpu.dimension_semantics<parallel>, #tpu.dimension_semantics<arbitrary>], iteration_bounds = array<i64: 2, 2, 1, 1>, scalar_prefetch = 0 : i64, scratch_operands = 1 : i64, tpu.core_type = #tpu.core_type<tc>, window_params = [{transform_indices = @transform_0, window_bounds = array<i64: 1, 8, 32>}, {transform_indices = @transform_1, window_bounds = array<i64: 1, 32, 8>}, {transform_indices = @transform_2, window_bounds = array<i64: 1, 1, 8>}, {transform_indices = @transform_3, window_bounds = array<i64: 1, 1, 8, 8>}]} {
    %c0_i32 = arith.constant 0 : i32
    %0 = arith.cmpi eq, %arg3, %c0_i32 : i32
    %1 = arith.extui %0 : i1 to i32
    %c0_i32_0 = arith.constant 0 : i32
    %2 = arith.cmpi ne, %1, %c0_i32_0 : i32
    scf.if %2 {
      %cst_12 = arith.constant 0.000000e+00 : f32
      %14 = vector.broadcast %cst_12 : f32 to vector<8x8xf32>
      %c0_13 = arith.constant 0 : index
      %c0_14 = arith.constant 0 : index
      %15 = vector.load %arg8[%c0_13, %c0_14] : memref<8x8xf32, #tpu.memory_space<vmem>>, vector<8x8xf32>
      tpu.vector_store %arg8[%c0_13, %c0_14], %14 {strides = array<i32>} : memref<8x8xf32, #tpu.memory_space<vmem>>, vector<8x8xf32>,
    } else {
    }
    %c0 = arith.constant 0 : index
    %c0_1 = arith.constant 0 : index
    %3 = vector.load %arg8[%c0, %c0_1] : memref<8x8xf32, #tpu.memory_space<vmem>>, vector<8x8xf32>
    %c0_2 = arith.constant 0 : index
    %c0_3 = arith.constant 0 : index
    %c0_4 = arith.constant 0 : index
    %4 = vector.load %arg4[%c0_2, %c0_3, %c0_4] : memref<1x8x32xf32, #tpu.memory_space<vmem>>, vector<1x8x32xf32>
    %5 = vector.shape_cast %4 : vector<1x8x32xf32> to vector<8x32xf32>
    %c0_5 = arith.constant 0 : index
    %c0_6 = arith.constant 0 : index
    %c0_7 = arith.constant 0 : index
    %6 = vector.load %arg5[%c0_5, %c0_6, %c0_7] : memref<1x32x8xf32, #tpu.memory_space<vmem>>, vector<1x32x8xf32>
    %7 = vector.shape_cast %6 : vector<1x32x8xf32> to vector<32x8xf32>
    %cst = arith.constant dense<0.000000e+00> : vector<8x8xf32>
    %8 = tpu.matmul %5, %7, %cst {dimension_numbers = #tpu.dot_dimension_numbers<[1], [0], [0], [1], [0, 0, 1, 1], [], []>} : vector<8x32xf32>, vector<32x8xf32>, vector<8x8xf32> -> vector<8x8xf32>
    %9 = arith.addf %3, %8 : vector<8x8xf32>
    %c0_8 = arith.constant 0 : index
    %c0_9 = arith.constant 0 : index
    %10 = vector.load %arg8[%c0_8, %c0_9] : memref<8x8xf32, #tpu.memory_space<vmem>>, vector<8x8xf32>
    tpu.vector_store %arg8[%c0_8, %c0_9], %9 {strides = array<i32>} : memref<8x8xf32, #tpu.memory_space<vmem>>, vector<8x8xf32>,
    %c0_i32_10 = arith.constant 0 : i32
    %11 = arith.cmpi eq, %arg3, %c0_i32_10 : i32
    %12 = arith.extui %11 : i1 to i32
    %c0_i32_11 = arith.constant 0 : i32
    %13 = arith.cmpi ne, %12, %c0_i32_11 : i32
    scf.if %13 {
      %c0_12 = arith.constant 0 : index
      %c0_13 = arith.constant 0 : index
      %14 = vector.load %arg8[%c0_12, %c0_13] : memref<8x8xf32, #tpu.memory_space<vmem>>, vector<8x8xf32>
      %c0_14 = arith.constant 0 : index
      %c0_15 = arith.constant 0 : index
      %c0_16 = arith.constant 0 : index
      %15 = vector.load %arg6[%c0_14, %c0_15, %c0_16] : memref<1x1x8xf32, #tpu.memory_space<vmem>>, vector<1x1x8xf32>
      %16 = vector.shape_cast %15 : vector<1x1x8xf32> to vector<1x8xf32>
      %17 = vector.broadcast %16 : vector<1x8xf32> to vector<8x8xf32>
      %18 = arith.addf %14, %17 : vector<8x8xf32>
      %c0_17 = arith.constant 0 : index
      %c0_18 = arith.constant 0 : index
      %c0_19 = arith.constant 0 : index
      %c0_20 = arith.constant 0 : index
      %19 = vector.load %arg7[%c0_17, %c0_18, %c0_19, %c0_20] : memref<1x1x8x8xf32, #tpu.memory_space<vmem>>, vector<1x1x8x8xf32>
      %20 = vector.shape_cast %19 : vector<1x1x8x8xf32> to vector<8x8xf32>
      %21 = vector.shape_cast %18 : vector<8x8xf32> to vector<1x1x8x8xf32>
      tpu.vector_store %arg7[%c0_17, %c0_18, %c0_19, %c0_20], %21 {strides = array<i32>} : memref<1x1x8x8xf32, #tpu.memory_space<vmem>>, vector<1x1x8x8xf32>,
    } else {
    }
    return
  }
  func.func @transform_0(%arg0: i32, %arg1: i32, %arg2: i32, %arg3: i32) -> (i32, i32, i32) {
    %c0_i32 = arith.constant 0 : i32
    return %arg0, %arg2, %arg3 : i32, i32, i32
  }
  func.func @transform_1(%arg0: i32, %arg1: i32, %arg2: i32, %arg3: i32) -> (i32, i32, i32) {
    %c0_i32 = arith.constant 0 : i32
    %c0_i32_0 = arith.constant 0 : i32
    return %arg1, %arg3, %c0_i32 : i32, i32, i32
  }
  func.func @transform_2(%arg0: i32, %arg1: i32, %arg2: i32, %arg3: i32) -> (i32, i32, i32) {
    %c0_i32 = arith.constant 0 : i32
    %c0_i32_0 = arith.constant 0 : i32
    %c0_i32_1 = arith.constant 0 : i32
    return %arg1, %c0_i32, %c0_i32_0 : i32, i32, i32
  }
  func.func @transform_3(%arg0: i32, %arg1: i32, %arg2: i32, %arg3: i32) -> (i32, i32, i32, i32) {
    %c0_i32 = arith.constant 0 : i32
    %c0_i32_0 = arith.constant 0 : i32
    return %arg0, %arg1, %arg2, %c0_i32 : i32, i32, i32, i32
  }
}

module attributes {stable_mosaic.version = 11 : i64} {
  func.func @_flash_attn_kernel(%arg0: i32, %arg1: i32, %arg2: i32, %arg3: i32, %arg4: i32, %arg5: memref<1x1x8x8xf32, #tpu.memory_space<vmem>>, %arg6: memref<1x1x8x8xf32, #tpu.memory_space<vmem>>, %arg7: memref<1x1x8x8xf32, #tpu.memory_space<vmem>>, %arg8: memref<1x1x8x8xf32, #tpu.memory_space<vmem>>, %arg9: memref<8x1xf32, #tpu.memory_space<vmem>>, %arg10: memref<8x1xf32, #tpu.memory_space<vmem>>, %arg11: memref<8x8xf32, #tpu.memory_space<vmem>>) attributes {dimension_semantics = [#tpu.dimension_semantics<parallel>, #tpu.dimension_semantics<parallel>, #tpu.dimension_semantics<parallel>, #tpu.dimension_semantics<parallel>, #tpu.dimension_semantics<arbitrary>], iteration_bounds = array<i64: 2, 2, 2, 1, 1>, scalar_prefetch = 0 : i64, scratch_operands = 3 : i64, tpu.core_type = #tpu.core_type<tc>, window_params = [{transform_indices = @transform_0, window_bounds = array<i64: 1, 1, 8, 8>}, {transform_indices = @transform_1, window_bounds = array<i64: 1, 1, 8, 8>}, {transform_indices = @transform_2, window_bounds = array<i64: 1, 1, 8, 8>}, {transform_indices = @transform_3, window_bounds = array<i64: 1, 1, 8, 8>}]} {
    %c0_i32 = arith.constant 0 : i32
    %0 = arith.cmpi eq, %arg4, %c0_i32 : i32
    %1 = arith.extui %0 : i1 to i32
    %c0_i32_0 = arith.constant 0 : i32
    %2 = arith.cmpi ne, %1, %c0_i32_0 : i32
    scf.if %2 {
      %cst = arith.constant -1.000000e+30 : f32
      %9 = vector.broadcast %cst : f32 to vector<8x1xf32>
      %c0 = arith.constant 0 : index
      %c0_3 = arith.constant 0 : index
      %10 = vector.load %arg9[%c0, %c0_3] : memref<8x1xf32, #tpu.memory_space<vmem>>, vector<8x1xf32>
      tpu.vector_store %arg9[%c0, %c0_3], %9 {strides = array<i32>} : memref<8x1xf32, #tpu.memory_space<vmem>>, vector<8x1xf32>,
      %cst_4 = arith.constant 0.000000e+00 : f32
      %11 = vector.broadcast %cst_4 : f32 to vector<8x1xf32>
      %c0_5 = arith.constant 0 : index
      %c0_6 = arith.constant 0 : index
      %12 = vector.load %arg10[%c0_5, %c0_6] : memref<8x1xf32, #tpu.memory_space<vmem>>, vector<8x1xf32>
      tpu.vector_store %arg10[%c0_5, %c0_6], %11 {strides = array<i32>} : memref<8x1xf32, #tpu.memory_space<vmem>>, vector<8x1xf32>,
      %cst_7 = arith.constant 0.000000e+00 : f32
      %13 = vector.broadcast %cst_7 : f32 to vector<8x8xf32>
      %c0_8 = arith.constant 0 : index
      %c0_9 = arith.constant 0 : index
      %14 = vector.load %arg11[%c0_8, %c0_9] : memref<8x8xf32, #tpu.memory_space<vmem>>, vector<8x8xf32>
      tpu.vector_store %arg11[%c0_8, %c0_9], %13 {strides = array<i32>} : memref<8x8xf32, #tpu.memory_space<vmem>>, vector<8x8xf32>,
    } else {
    }
    %3 = arith.cmpi sle, %arg4, %arg3 : i32
    %4 = arith.extui %3 : i1 to i32
    %c0_i32_1 = arith.constant 0 : i32
    %5 = arith.cmpi ne, %4, %c0_i32_1 : i32
    scf.if %5 {
      %c0 = arith.constant 0 : index
      %c0_3 = arith.constant 0 : index
      %c0_4 = arith.constant 0 : index
      %c0_5 = arith.constant 0 : index
      %9 = vector.load %arg5[%c0, %c0_3, %c0_4, %c0_5] : memref<1x1x8x8xf32, #tpu.memory_space<vmem>>, vector<1x1x8x8xf32>
      %10 = vector.shape_cast %9 : vector<1x1x8x8xf32> to vector<8x8xf32>
      %cst = arith.constant 0.353553385 : f32
      %11 = vector.broadcast %cst : f32 to vector<8x8xf32>
      %12 = arith.mulf %10, %11 : vector<8x8xf32>
      %c0_6 = arith.constant 0 : index
      %c0_7 = arith.constant 0 : index
      %c0_8 = arith.constant 0 : index
      %c0_9 = arith.constant 0 : index
      %13 = vector.load %arg6[%c0_6, %c0_7, %c0_8, %c0_9] : memref<1x1x8x8xf32, #tpu.memory_space<vmem>>, vector<1x1x8x8xf32>
      %14 = vector.shape_cast %13 : vector<1x1x8x8xf32> to vector<8x8xf32>
      %c0_10 = arith.constant 0 : index
      %c0_11 = arith.constant 0 : index
      %c0_12 = arith.constant 0 : index
      %c0_13 = arith.constant 0 : index
      %15 = vector.load %arg7[%c0_10, %c0_11, %c0_12, %c0_13] : memref<1x1x8x8xf32, #tpu.memory_space<vmem>>, vector<1x1x8x8xf32>
      %16 = vector.shape_cast %15 : vector<1x1x8x8xf32> to vector<8x8xf32>
      %cst_14 = arith.constant dense<0.000000e+00> : vector<8x8xf32>
      %17 = tpu.matmul %12, %14, %cst_14 {dimension_numbers = #tpu.dot_dimension_numbers<[1], [1], [0], [0], [0, 0, 1, 0], [], []>} : vector<8x8xf32>, vector<8x8xf32>, vector<8x8xf32> -> vector<8x8xf32>
      %18 = tpu.iota {dimensions = array<i32: 0>} : vector<8x8xi32>
      %19 = tpu.iota {dimensions = array<i32: 1>} : vector<8x8xi32>
      %20 = arith.cmpi slt, %arg4, %arg3 : i32
      %21 = arith.cmpi sle, %19, %18 : vector<8x8xi32>
      %22 = vector.broadcast %20 : i1 to vector<8x8xi1>
      %23 = arith.ori %22, %21 : vector<8x8xi1>
      %cst_15 = arith.constant -1.000000e+30 : f32
      %24 = vector.broadcast %cst_15 : f32 to vector<8x8xf32>
      %25 = arith.select %23, %17, %24 : vector<8x8xi1>, vector<8x8xf32>
      %c0_16 = arith.constant 0 : index
      %c0_17 = arith.constant 0 : index
      %26 = vector.load %arg9[%c0_16, %c0_17] : memref<8x1xf32, #tpu.memory_space<vmem>>, vector<8x1xf32>
      %cst_18 = arith.constant dense<0xFF800000> : vector<8xf32>
      %27 = vector.multi_reduction <maximumf>, %25, %cst_18 [1] : vector<8x8xf32> to vector<8xf32>
      %28 = vector.shape_cast %27 : vector<8xf32> to vector<8x1xf32>
      %29 = arith.maximumf %26, %28 : vector<8x1xf32>
      %30 = arith.subf %26, %29 : vector<8x1xf32>
      %31 = math.exp %30 : vector<8x1xf32>
      %32 = vector.broadcast %29 : vector<8x1xf32> to vector<8x8xf32>
      %33 = arith.subf %25, %32 : vector<8x8xf32>
      %34 = math.exp %33 : vector<8x8xf32>
      %c0_19 = arith.constant 0 : index
      %c0_20 = arith.constant 0 : index
      %35 = vector.load %arg10[%c0_19, %c0_20] : memref<8x1xf32, #tpu.memory_space<vmem>>, vector<8x1xf32>
      %36 = arith.mulf %31, %35 : vector<8x1xf32>
      %cst_21 = arith.constant dense<0.000000e+00> : vector<8xf32>
      %37 = vector.multi_reduction <add>, %34, %cst_21 [1] : vector<8x8xf32> to vector<8xf32>
      %38 = vector.shape_cast %37 : vector<8xf32> to vector<8x1xf32>
      %39 = arith.addf %36, %38 : vector<8x1xf32>
      %c0_22 = arith.constant 0 : index
      %c0_23 = arith.constant 0 : index
      %40 = vector.load %arg10[%c0_22, %c0_23] : memref<8x1xf32, #tpu.memory_space<vmem>>, vector<8x1xf32>
      tpu.vector_store %arg10[%c0_22, %c0_23], %39 {strides = array<i32>} : memref<8x1xf32, #tpu.memory_space<vmem>>, vector<8x1xf32>,
      %c0_24 = arith.constant 0 : index
      %c0_25 = arith.constant 0 : index
      %41 = vector.load %arg11[%c0_24, %c0_25] : memref<8x8xf32, #tpu.memory_space<vmem>>, vector<8x8xf32>
      %42 = vector.broadcast %31 : vector<8x1xf32> to vector<8x8xf32>
      %43 = arith.mulf %42, %41 : vector<8x8xf32>
      %cst_26 = arith.constant dense<0.000000e+00> : vector<8x8xf32>
      %44 = tpu.matmul %34, %16, %cst_26 {dimension_numbers = #tpu.dot_dimension_numbers<[1], [0], [0], [1], [0, 0, 1, 1], [], []>} : vector<8x8xf32>, vector<8x8xf32>, vector<8x8xf32> -> vector<8x8xf32>
      %45 = arith.addf %43, %44 : vector<8x8xf32>
      %c0_27 = arith.constant 0 : index
      %c0_28 = arith.constant 0 : index
      %46 = vector.load %arg11[%c0_27, %c0_28] : memref<8x8xf32, #tpu.memory_space<vmem>>, vector<8x8xf32>
      tpu.vector_store %arg11[%c0_27, %c0_28], %45 {strides = array<i32>} : memref<8x8xf32, #tpu.memory_space<vmem>>, vector<8x8xf32>,
      %c0_29 = arith.constant 0 : index
      %c0_30 = arith.constant 0 : index
      %47 = vector.load %arg9[%c0_29, %c0_30] : memref<8x1xf32, #tpu.memory_space<vmem>>, vector<8x1xf32>
      tpu.vector_store %arg9[%c0_29, %c0_30], %29 {strides = array<i32>} : memref<8x1xf32, #tpu.memory_space<vmem>>, vector<8x1xf32>,
    } else {
    }
    %6 = arith.cmpi eq, %arg4, %arg3 : i32
    %7 = arith.extui %6 : i1 to i32
    %c0_i32_2 = arith.constant 0 : i32
    %8 = arith.cmpi ne, %7, %c0_i32_2 : i32
    scf.if %8 {
      %c0 = arith.constant 0 : index
      %c0_3 = arith.constant 0 : index
      %9 = vector.load %arg10[%c0, %c0_3] : memref<8x1xf32, #tpu.memory_space<vmem>>, vector<8x1xf32>
      %10 = tpu.reciprocal %9 {approx = true} : vector<8x1xf32> -> vector<8x1xf32>
      %c0_4 = arith.constant 0 : index
      %c0_5 = arith.constant 0 : index
      %11 = vector.load %arg11[%c0_4, %c0_5] : memref<8x8xf32, #tpu.memory_space<vmem>>, vector<8x8xf32>
      %12 = vector.broadcast %10 : vector<8x1xf32> to vector<8x8xf32>
      %13 = arith.mulf %11, %12 : vector<8x8xf32>
      %c0_6 = arith.constant 0 : index
      %c0_7 = arith.constant 0 : index
      %c0_8 = arith.constant 0 : index
      %c0_9 = arith.constant 0 : index
      %14 = vector.load %arg8[%c0_6, %c0_7, %c0_8, %c0_9] : memref<1x1x8x8xf32, #tpu.memory_space<vmem>>, vector<1x1x8x8xf32>
      %15 = vector.shape_cast %14 : vector<1x1x8x8xf32> to vector<8x8xf32>
      %16 = vector.shape_cast %13 : vector<8x8xf32> to vector<1x1x8x8xf32>
      tpu.vector_store %arg8[%c0_6, %c0_7, %c0_8, %c0_9], %16 {strides = array<i32>} : memref<1x1x8x8xf32, #tpu.memory_space<vmem>>, vector<1x1x8x8xf32>,
    } else {
    }
    return
  }
  func.func @transform_0(%arg0: i32, %arg1: i32, %arg2: i32, %arg3: i32, %arg4: i32) -> (i32, i32, i32, i32) {
    %c2_i32 = arith.constant 2 : i32
    %0 = arith.muli %arg1, %c2_i32 : i32
    %1 = arith.addi %0, %arg2 : i32
    %c0_i32 = arith.constant 0 : i32
    %c0_i32_0 = arith.constant 0 : i32
    return %arg0, %1, %arg3, %c0_i32 : i32, i32, i32, i32
  }
  func.func @transform_1(%arg0: i32, %arg1: i32, %arg2: i32, %arg3: i32, %arg4: i32) -> (i32, i32, i32, i32) {
    %0 = arith.minsi %arg4, %arg3 : i32
    %c0_i32 = arith.constant 0 : i32
    %c0_i32_0 = arith.constant 0 : i32
    return %arg0, %arg1, %0, %c0_i32 : i32, i32, i32, i32
  }
  func.func @transform_2(%arg0: i32, %arg1: i32, %arg2: i32, %arg3: i32, %arg4: i32) -> (i32, i32, i32, i32) {
    %0 = arith.minsi %arg4, %arg3 : i32
    %c0_i32 = arith.constant 0 : i32
    %c0_i32_0 = arith.constant 0 : i32
    return %arg0, %arg1, %0, %c0_i32 : i32, i32, i32, i32
  }
  func.func @transform_3(%arg0: i32, %arg1: i32, %arg2: i32, %arg3: i32, %arg4: i32) -> (i32, i32, i32, i32) {
    %c2_i32 = arith.constant 2 : i32
    %0 = arith.muli %arg1, %c2_i32 : i32
    %1 = arith.addi %0, %arg2 : i32
    %c0_i32 = arith.constant 0 : i32
    %c0_i32_0 = arith.constant 0 : i32
    return %arg0, %1, %arg3, %c0_i32 : i32, i32, i32, i32
  }
}

module attributes {stable_mosaic.version = 11 : i64} {
  func.func @_oproj_kernel(%arg0: i32, %arg1: i32, %arg2: i32, %arg3: i32, %arg4: memref<1x1x8x8xf32, #tpu.memory_space<vmem>>, %arg5: memref<1x8x32xf32, #tpu.memory_space<vmem>>, %arg6: memref<1x8x32xf32, #tpu.memory_space<vmem>>, %arg7: memref<8x32xf32, #tpu.memory_space<vmem>>) attributes {dimension_semantics = [#tpu.dimension_semantics<parallel>, #tpu.dimension_semantics<parallel>, #tpu.dimension_semantics<parallel>, #tpu.dimension_semantics<arbitrary>], iteration_bounds = array<i64: 2, 1, 1, 4>, scalar_prefetch = 0 : i64, scratch_operands = 1 : i64, tpu.core_type = #tpu.core_type<tc>, window_params = [{transform_indices = @transform_0, window_bounds = array<i64: 1, 1, 8, 8>}, {transform_indices = @transform_1, window_bounds = array<i64: 1, 8, 32>}, {transform_indices = @transform_2, window_bounds = array<i64: 1, 8, 32>}]} {
    %c0_i32 = arith.constant 0 : i32
    %0 = arith.cmpi eq, %arg3, %c0_i32 : i32
    %1 = arith.extui %0 : i1 to i32
    %c0_i32_0 = arith.constant 0 : i32
    %2 = arith.cmpi ne, %1, %c0_i32_0 : i32
    scf.if %2 {
      %cst_12 = arith.constant 0.000000e+00 : f32
      %14 = vector.broadcast %cst_12 : f32 to vector<8x32xf32>
      %c0_13 = arith.constant 0 : index
      %c0_14 = arith.constant 0 : index
      %15 = vector.load %arg7[%c0_13, %c0_14] : memref<8x32xf32, #tpu.memory_space<vmem>>, vector<8x32xf32>
      tpu.vector_store %arg7[%c0_13, %c0_14], %14 {strides = array<i32>} : memref<8x32xf32, #tpu.memory_space<vmem>>, vector<8x32xf32>,
    } else {
    }
    %c0 = arith.constant 0 : index
    %c0_1 = arith.constant 0 : index
    %3 = vector.load %arg7[%c0, %c0_1] : memref<8x32xf32, #tpu.memory_space<vmem>>, vector<8x32xf32>
    %c0_2 = arith.constant 0 : index
    %c0_3 = arith.constant 0 : index
    %c0_4 = arith.constant 0 : index
    %c0_5 = arith.constant 0 : index
    %4 = vector.load %arg4[%c0_2, %c0_3, %c0_4, %c0_5] : memref<1x1x8x8xf32, #tpu.memory_space<vmem>>, vector<1x1x8x8xf32>
    %5 = vector.shape_cast %4 : vector<1x1x8x8xf32> to vector<8x8xf32>
    %c0_6 = arith.constant 0 : index
    %c0_7 = arith.constant 0 : index
    %c0_8 = arith.constant 0 : index
    %6 = vector.load %arg5[%c0_6, %c0_7, %c0_8] : memref<1x8x32xf32, #tpu.memory_space<vmem>>, vector<1x8x32xf32>
    %7 = vector.shape_cast %6 : vector<1x8x32xf32> to vector<8x32xf32>
    %cst = arith.constant dense<0.000000e+00> : vector<8x32xf32>
    %8 = tpu.matmul %5, %7, %cst {dimension_numbers = #tpu.dot_dimension_numbers<[1], [0], [0], [1], [0, 0, 1, 1], [], []>} : vector<8x8xf32>, vector<8x32xf32>, vector<8x32xf32> -> vector<8x32xf32>
    %9 = arith.addf %3, %8 : vector<8x32xf32>
    %c0_9 = arith.constant 0 : index
    %c0_10 = arith.constant 0 : index
    %10 = vector.load %arg7[%c0_9, %c0_10] : memref<8x32xf32, #tpu.memory_space<vmem>>, vector<8x32xf32>
    tpu.vector_store %arg7[%c0_9, %c0_10], %9 {strides = array<i32>} : memref<8x32xf32, #tpu.memory_space<vmem>>, vector<8x32xf32>,
    %c3_i32 = arith.constant 3 : i32
    %11 = arith.cmpi eq, %arg3, %c3_i32 : i32
    %12 = arith.extui %11 : i1 to i32
    %c0_i32_11 = arith.constant 0 : i32
    %13 = arith.cmpi ne, %12, %c0_i32_11 : i32
    scf.if %13 {
      %c0_12 = arith.constant 0 : index
      %c0_13 = arith.constant 0 : index
      %14 = vector.load %arg7[%c0_12, %c0_13] : memref<8x32xf32, #tpu.memory_space<vmem>>, vector<8x32xf32>
      %c0_14 = arith.constant 0 : index
      %c0_15 = arith.constant 0 : index
      %c0_16 = arith.constant 0 : index
      %15 = vector.load %arg6[%c0_14, %c0_15, %c0_16] : memref<1x8x32xf32, #tpu.memory_space<vmem>>, vector<1x8x32xf32>
      %16 = vector.shape_cast %15 : vector<1x8x32xf32> to vector<8x32xf32>
      %17 = vector.shape_cast %14 : vector<8x32xf32> to vector<1x8x32xf32>
      tpu.vector_store %arg6[%c0_14, %c0_15, %c0_16], %17 {strides = array<i32>} : memref<1x8x32xf32, #tpu.memory_space<vmem>>, vector<1x8x32xf32>,
    } else {
    }
    return
  }
  func.func @transform_0(%arg0: i32, %arg1: i32, %arg2: i32, %arg3: i32) -> (i32, i32, i32, i32) {
    %c0_i32 = arith.constant 0 : i32
    %c0_i32_0 = arith.constant 0 : i32
    return %arg0, %arg3, %arg1, %c0_i32 : i32, i32, i32, i32
  }
  func.func @transform_1(%arg0: i32, %arg1: i32, %arg2: i32, %arg3: i32) -> (i32, i32, i32) {
    %c0_i32 = arith.constant 0 : i32
    %c0_i32_0 = arith.constant 0 : i32
    return %arg3, %c0_i32, %arg2 : i32, i32, i32
  }
  func.func @transform_2(%arg0: i32, %arg1: i32, %arg2: i32, %arg3: i32) -> (i32, i32, i32) {
    %c0_i32 = arith.constant 0 : i32
    return %arg0, %arg1, %arg2 : i32, i32, i32
  }
}

</mosaic_0001>

<bundles_post_ra>
// kernel: neg.1
= control target key start
LH: loop header
LB: loop body
LE: loop exit
PB: predicated region body
PF: predicated region fallthrough
CT: control target
= control target key end

     0   :  { %s24_s0 = inlined_call_operand.vmem [shape: f32[8,4], index: 0, kind: input, shape index: {}]   ;;  %s25_s1 = inlined_call_operand.vmem [shape: f32[8,4], index: 1, kind: output, shape index: {}]  }
   0x1   :  { %v2_v0 = vld [vmem:[%s24_s0] sm:$0xff] }
   0x2   :  { %v5_v1 = vxor.u32 2147483648, %v2_v0 }
   0x4   :  { %7 = vst [vmem:[%s25_s1] sm:$0xff] %v5_v1 }

// kernel: skyer_sdpa_attention.8
= control target key start
LH: loop header
LB: loop body
LE: loop exit
PB: predicated region body
PF: predicated region fallthrough
CT: control target
= control target key end

     0   :  { %s836_s12 = smov 0   ;;  %s838_s13 = smov 0   ;;  %s937_s0 = inlined_call_operand.vmem [shape: f32[2,4,8,8], index: 0, kind: input, shape index: {}]   ;;  %s938_s1 = inlined_call_operand.vmem [shape: f32[2,2,8,8], index: 1, kind: input, shape index: {}]   ;;  %s939_s2 = inlined_call_operand.vmem [shape: f32[2,2,8,8], index: 2, kind: input, shape index: {}]   ;;  %s940_s3 = inlined_call_operand.vmem [shape: f32[2,4,8,8], index: 3, kind: output, shape index: {}]  }
   0x1   :  { %s840_s14 = smov 0   ;;  %s842_s15 = smov 0  }
   0x2   :  { %s844_s16 = smov 0   ;;  %s846_s17 = smov 0  }
   0x3   :  { %s848_s18 = smov 0  }
   0x4 LB: > { %s38_s19 = sadd.s32 1, %s799_s15  ;;  %s42_s20 = sadd.s32 1, %s803_s16  ;;  %s811_s18 = sphi %s848_s18, %s13_s18   ;;  %s807_s17 = sphi %s846_s17, %s946_s17   ;;  %s803_s16 = sphi %s844_s16, %s945_s16   ;;  %s799_s15 = sphi %s842_s15, %s944_s15   ;;  %s795_s14 = sphi %s840_s14, %s943_s14   ;;  %s791_s13 = sphi %s838_s13, %s942_s13   ;;  %s787_s12 = sphi %s836_s12, %s941_s12  }
   0x5   : > { %p40_p0 = scmp.ge.s32.totalorder %s38_s19, 2  ;;  %p673_p1 = scmp.ge.s32.totalorder %s811_s18, 1 }
   0x6   : > { %p252_p2 = scmp.lt.s32.totalorder %s811_s18, 9  ;;  %s46_s21 = sadd.s32 1, %s807_s17 }
   0x7   : > { %s948_s19 = smov (%p40_p0, %s38_s19), 0  ;;  %s950_s20 = smov (!%p40_p0, %s42_s20), %s803_s16 }
   0x8   : > { %p253_p3 = pnand %p673_p1, %p252_p2  ;;  %p44_p4 = scmp.ge.s32.totalorder %s950_s20, 2 }
   0x9   : > { %p320_p6 = scmp.lt.s32.totalorder (!%p253_p3), %s795_s14, 1  ;;  %p337_p7 = scmp.lt.s32.totalorder (!%p253_p3), %s791_s13, 1 }
   0xa   : > { %s952_s20 = smov (%p44_p4, %s950_s20), 0  ;;  %s954_s21 = smov (!%p44_p4, %s46_s21), %s807_s17 }
   0xb   : > { %p48_p5 = scmp.ge.s32.totalorder %s954_s21, 2  ;;  %256 = sbr.rel (%p253_p3) target bundleno = 625 (0x271), region = 32 }
   0xc   : > { %s674_s22 = sshll.u32 (!%p253_p3), %s791_s13, 1 }
   0xd   : > { %s956_s21 = smov (%p48_p5, %s954_s21), 0  ;;  %s319_s24 = sadd.s32 (!%p253_p3), %s787_s12, %s674_s22 }
   0xe   : > { %p322_p8 = scmp.lt.s32.totalorder (!%p253_p3), %s319_s24, 3 }
  0x10   : > { %s958_s14 = smov (!%p320_p6, %s795_s14), 1  ;;  %s960_s13 = smov (!%p337_p7, %s791_s13), 1  ;;  %vm385_vm0 = vcmask 64512   ;;  %vm382_vm1 = vcmask 7168   ;;  %v813_v3 = vmov -1e+30   ;;  %v422_v4 = vlaneseq }
  0x11   : > { %s677_s23 = sshll.u32 %s958_s14, 1  ;;  %s675_s30 = sshll.u32 %s958_s14, 2  ;;  %383 = vst.msk [vmem:[#allocation2] sm:$0xff] %vm382_vm1, %v813_v3  ;;  %v814_v10 = vmov 0   ;;  %v815_v11 = vmov 0.0  }
  0x12   : > { %s878_s25 = sadd.s32 %s677_s23, %s960_s13  ;;  %s962_s24 = smov (!%p322_p8, %s319_s24), 3  ;;  %v423_v5 = vshrl.u32 %v422_v4, 7  ;;  %v425_v6 = vand.u32 127, %v422_v4  ;;  %748 = vset.pattern.permute.xlu0 %v814_v10  ;;  %749 = vset.pattern.permute.xlu1 %v814_v10  ;;  %384 = vst.msk [vmem:[#allocation3] sm:$0xff] %vm382_vm1, %v815_v11 }
  0x13   : > { %s678_s26 = sshll.u32 %s878_s25, 3  ;;  %s887_s4 = sadd.s32 %s675_s30, %s962_s24  ;;  %750 = vset.pattern.permute.xlu2 %v814_v10  ;;  %386 = vst.msk [vmem:[#allocation4] sm:$0xff] %vm385_vm0, %v815_v11 }
  0x14   : > { %s345_s29 = scalar_lea.vmem %s938_s1, %s678_s26  ;;  %s676_s5 = sshll.u32 %s887_s4, 3  ;;  %vm427_vm2 = vcmp.le.s32.totalorder %v425_v6, %v423_v5 }
  0x15   : > { %v393_v0 = vld [vmem:[%s345_s29] sm:$0xff]  ;;  %s330_s8 = scalar_lea.vmem %s937_s0, %s676_s5  ;;  %s360_s11 = scalar_lea.vmem %s939_s2, %s678_s26 }
  0x16   : > { %684 = vmatpush.xpose.msk.msra.mxu0 %vm385_vm0, %v393_v0  ;;  %v391_v1 = vld [vmem:[%s330_s8] sm:$0xff]  ;;  %s375_s14 = scalar_lea.vmem %s940_s3, %s676_s5 }
  0x17   : > { %v392_v2 = vmul.f32 0.35355338, %v391_v1  ;;  %v394_v16 = vld [vmem:[%s360_s11] sm:$0xff] }
  0x18   : > { %v433_v12 = vld [vmem:[#allocation2] sm:$0xff]  ;;  %482 = vmatpush.msra.mxu1 %v394_v16 }
  0x19   : > { %685 = vmatmul.msk.f32.vlgmr.msra.gmra.mxu0 %vm385_vm0, %v392_v2  ;;  %v449_v24 = vld [vmem:[#allocation3] sm:$0xff] }
  0x1a   : > { %v457_v30 = vld [vmem:[#allocation4] sm:$0xff] }
  0x96   : > { %v419_v7 = vpop.f32.mrf.mxu0 }
  0x97   : > { %v432_v8 = vsel %vm427_vm2, %v419_v7, -1e+30 }
  0x98   : > { %v434_v9 = vsel %vm385_vm0, %v432_v8, -inf }
  0x99   : > { %435 = vmax.xlane.f32.xlu0 %v434_v9 }
 0x10c   : > { %v436_v13 = vpop.xlane.xlu0 %435 }
 0x10d   : > { %v437_v14 = vmax.f32 %v433_v12, %v436_v13 }
 0x10f   : > { %v438_v15 = vsub.f32 %v433_v12, %v437_v14  ;;  %489 = vst.msk [vmem:[#allocation2] sm:$0xff] %vm382_vm1, %v437_v14  ;;  %443 = vperm.xlu0 %748, %v437_v14  }
 0x111   : > { %v439_v22 = vmul.f32 1.442695, %v438_v15 }
 0x181   : > { %v444_v17 = vpop.permute.xlu0 %443 }
 0x182   : > { %v446_v18 = vsub.f32 %v432_v8, %v444_v17 }
 0x184   : > { %v447_v19 = vmul.f32 1.442695, %v446_v18 }
 0x186   : > { %751 = vpow2.f32 %v447_v19 }
 0x187   : > { %753 = vpow2.f32 %v439_v22 }
 0x18c   : > { %v752_v20 = vpop.eup %751 }
 0x18d   : > { %686 = vmatmul.msk.f32.vlgmr.msra.gmra.mxu1 %vm385_vm0, %v752_v20  ;;  %v451_v21 = vsel %vm385_vm0, %v752_v20, 0.0  ;;  %v754_v23 = vpop.eup %753 }
 0x18e   : > { %452 = vadd.xlane.f32.xlu1 %v451_v21  ;;  %v450_v25 = vmul.f32 %v754_v23, %v449_v24 }
 0x1a7   : > { %460 = vperm.xlu1 %749, %v754_v23  }
 0x201   : > { %v453_v26 = vpop.xlane.xlu1 %452 }
 0x202   : > { %v454_v27 = vadd.f32 %v453_v26, %v450_v25 }
 0x204   : > { %456 = vst.msk [vmem:[#allocation3] sm:$0xff] %vm382_vm1, %v454_v27 }
 0x20a   : > { %v484_v33 = vpop.f32.mrf.mxu1 }
 0x20b   : > { %v494_v28 = vld [vmem:[#allocation3] sm:$0xff] }
 0x20c   : > { %755 = vrcp.f32 %v494_v28 }
 0x212   : > { %v756_v29 = vpop.eup %755 }
 0x213   : > { %499 = vperm.xlu2 %750, %v756_v29  }
 0x219   : > { %v461_v31 = vpop.permute.xlu1 %460 }
 0x21a   : > { %v463_v32 = vmul.f32 %v461_v31, %v457_v30 }
 0x21c   : > { %v487_v34 = vadd.f32 %v484_v33, %v463_v32 }
 0x21e   : > { %488 = vst.msk [vmem:[#allocation4] sm:$0xff] %vm385_vm0, %v487_v34 }
 0x225   : > { %v496_v35 = vld [vmem:[#allocation4] sm:$0xff] }
 0x26d   : > { %v500_v36 = vpop.permute.xlu2 %499 }
 0x26e   : > { %v502_v37 = vmul.f32 %v500_v36, %v496_v35 }
 0x270   : > { %504 = vst.msk [vmem:[%s375_s14] sm:$0xff] %vm385_vm0, %v502_v37 }
 0x271 PF: > { %s13_s18 = sadd.s32 1, %s811_s18   ;;  %s941_s12 = smov %s799_s15 }
 0x272   : > { %p10_p9 = scmp.ge.s32.totalorder %s13_s18, 10   ;;  %s942_s13 = smov %s803_s16 }
 0x273   : > { %s943_s14 = smov %s807_s17  ;;  %s944_s15 = smov %s948_s19 }
 0x274   : > { %s945_s16 = smov %s952_s20  ;;  %s946_s17 = smov %s956_s21 }
 0x275   :  { %12 = sbr.rel (!%p10_p9) target bundleno = 4 (0x4), region = 80 }

// kernel: skyer_sdpa_attention.7
= control target key start
LH: loop header
LB: loop body
LE: loop exit
PB: predicated region body
PF: predicated region fallthrough
CT: control target
= control target key end

     0   :  { %s577_s12 = smov 0   ;;  %s579_s13 = smov 0   ;;  %s637_s0 = inlined_call_operand.vmem [shape: f32[2,8,32], index: 0, kind: input, shape index: {}]   ;;  %s638_s1 = inlined_call_operand.vmem [shape: f32[2,32,8], index: 1, kind: input, shape index: {}]   ;;  %s639_s2 = inlined_call_operand.vmem [shape: f32[2,1,8], index: 2, kind: input, shape index: {}]   ;;  %s640_s3 = inlined_call_operand.vmem [shape: f32[2,2,8,8], index: 3, kind: output, shape index: {}]  }
   0x1   :  { %s581_s14 = smov 0   ;;  %s583_s15 = smov 0  }
   0x2   :  { %s585_s16 = smov 0  }
   0x3 LB: > { %s35_s17 = sadd.s32 1, %s546_s14  ;;  %s39_s18 = sadd.s32 1, %s550_s15  ;;  %s554_s16 = sphi %s585_s16, %s13_s16   ;;  %s550_s15 = sphi %s583_s15, %s644_s15   ;;  %s546_s14 = sphi %s581_s14, %s643_s14   ;;  %s542_s13 = sphi %s579_s13, %s642_s13   ;;  %s538_s12 = sphi %s577_s12, %s641_s12  }
   0x4   : > { %p37_p0 = scmp.ge.s32.totalorder %s35_s17, 2  ;;  %p464_p1 = scmp.ge.s32.totalorder %s554_s16, 1 }
   0x5   : > { %p201_p2 = scmp.lt.s32.totalorder %s554_s16, 5 }
   0x6   : > { %s646_s17 = smov (%p37_p0, %s35_s17), 0  ;;  %s648_s18 = smov (!%p37_p0, %s39_s18), %s550_s15 }
   0x7   : > { %p202_p3 = pnand %p464_p1, %p201_p2  ;;  %p41_p4 = scmp.ge.s32.totalorder %s648_s18, 2 }
   0x8   : > { %p259_p5 = scmp.lt.s32.totalorder (!%p202_p3), %s538_s12, 1  ;;  %p248_p6 = scmp.lt.s32.totalorder (!%p202_p3), %s542_s13, 1 }
   0x9   : > { %s650_s18 = smov (%p41_p4, %s648_s18), 0  ;;  %205 = sbr.rel (%p202_p3) target bundleno = 164 (0xa4), region = 32 }
   0xe   : > { %vm286_vm0 = vcmask 64512   ;;  %v556_v0 = vmov 0.0   ;;  %s652_s12 = smov (!%p259_p5, %s538_s12), 1  ;;  %s654_s13 = smov (!%p248_p6, %s542_s13), 1  ;;  %vm294_vm1 = vcmask 261120  }
   0xf   : > { %287 = vst.msk [vmem:[#allocation2] sm:$0xff] %vm286_vm0, %v556_v0  ;;  %s473_s19 = sshll.u32 %s652_s12, 5  ;;  %s270_s22 = scalar_lea.vmem %s639_s2, %s652_s12 }
  0x10   : > { %s266_s25 = scalar_lea.vmem %s638_s1, %s473_s19  ;;  %s465_s26 = sshll.u32 %s654_s13, 3  ;;  %v515_v9 = vld [vmem:[%s270_s22] ss:$0 sm:$0xff] }
  0x11   : > { %v293_v1 = vld [vmem:[%s266_s25 + $0x18] sm:$0xff]  ;;  %v292_v2 = vld [vmem:[%s266_s25 + $0x10] sm:$0xff]  ;;  %s468_s27 = sshll.u32 %s654_s13, 1  ;;  %v291_v3 = vld [vmem:[%s266_s25 + $0x8] sm:$0xff]  ;;  %s257_s4 = scalar_lea.vmem %s637_s0, %s465_s26 }
  0x12   : > { %310 = vmatpush.msra.mxu0 %v293_v1  ;;  %s279_s28 = sadd.s32 %s468_s27, %s652_s12  ;;  %v290_v4 = vld [vmem:[%s266_s25] sm:$0xff] }
  0x13   : > { %v289_v5 = vld [vmem:[%s257_s4] sm:$0xff]  ;;  %s469_s5 = sshll.u32 %s279_s28, 3 }
  0x14   : > { %311 = vmatpush.msra.mxu0 %v292_v2  ;;  %s281_s8 = scalar_lea.vmem %s640_s3, %s469_s5 }
  0x16   : > { %312 = vmatpush.msra.mxu0 %v291_v3  ;;  %v288_v6 = vld [vmem:[#allocation2] sm:$0xff] }
  0x18   : > { %313 = vmatpush.msra.mxu0 %v290_v4 }
  0x19   : > { %470 = vmatmul.msk.f32.vlgmr.msra.gmra.mxu0 %vm294_vm1, %v289_v5 }
  0x96   : > { %v315_v7 = vpop.f32.mrf.mxu0 }
  0x97   : > { %v318_v8 = vadd.f32 %v315_v7, %v288_v6 }
  0x99   : > { %320 = vst.msk [vmem:[#allocation2] sm:$0xff] %vm286_vm0, %v318_v8 }
  0xa0   : > { %v324_v10 = vld [vmem:[#allocation2] sm:$0xff] }
  0xa1   : > { %v329_v11 = vadd.f32 %v515_v9, %v324_v10 }
  0xa3   : > { %330 = vst.msk [vmem:[%s281_s8] sm:$0xff] %vm286_vm0, %v329_v11 }
  0xa4 PF: > { %s13_s16 = sadd.s32 1, %s554_s16   ;;  %s641_s12 = smov %s546_s14 }
  0xa5   : > { %p10_p7 = scmp.ge.s32.totalorder %s13_s16, 6   ;;  %s642_s13 = smov %s550_s15 }
  0xa6   : > { %s643_s14 = smov %s646_s17  ;;  %s644_s15 = smov %s650_s18 }
  0xa7   :  { %12 = sbr.rel (!%p10_p7) target bundleno = 3 (0x3), region = 76 }

// kernel: skyer_sdpa_attention.6
= control target key start
LH: loop header
LB: loop body
LE: loop exit
PB: predicated region body
PF: predicated region fallthrough
CT: control target
= control target key end

     0   :  { %s726_s18 = smov 0   ;;  %s728_s19 = smov 0   ;;  %s795_s0 = inlined_call_operand.vmem [shape: f32[2,8,32], index: 0, kind: input, shape index: {}]   ;;  %s796_s1 = inlined_call_operand.vmem [shape: f32[2,32,8], index: 1, kind: input, shape index: {}]   ;;  %s797_s2 = inlined_call_operand.vmem [shape: f32[2,1,8], index: 2, kind: input, shape index: {}]   ;;  %s798_s3 = inlined_call_operand.vmem [shape: f32[8,8], index: 3, kind: input, shape index: {}]   ;;  %s799_s4 = inlined_call_operand.vmem [shape: f32[8,8], index: 4, kind: input, shape index: {}]   ;;  %s800_s5 = inlined_call_operand.vmem [shape: f32[2,2,8,8], index: 5, kind: output, shape index: {}]  }
   0x1   :  { %s730_s20 = smov 0   ;;  %s732_s21 = smov 0  }
   0x2   :  { %s734_s22 = smov 0  }
   0x3 LB: > { %s37_s23 = sadd.s32 1, %s683_s20  ;;  %s41_s24 = sadd.s32 1, %s687_s21  ;;  %s691_s22 = sphi %s734_s22, %s15_s22   ;;  %s687_s21 = sphi %s732_s21, %s804_s21   ;;  %s683_s20 = sphi %s730_s20, %s803_s20   ;;  %s679_s19 = sphi %s728_s19, %s802_s19   ;;  %s675_s18 = sphi %s726_s18, %s801_s18  }
   0x4   : > { %p39_p0 = scmp.ge.s32.totalorder %s37_s23, 2  ;;  %p599_p1 = scmp.ge.s32.totalorder %s691_s22, 1 }
   0x5   : > { %p269_p2 = scmp.lt.s32.totalorder %s691_s22, 5 }
   0x6   : > { %s806_s23 = smov (%p39_p0, %s37_s23), 0  ;;  %s808_s24 = smov (!%p39_p0, %s41_s24), %s687_s21 }
   0x7   : > { %p270_p3 = pnand %p599_p1, %p269_p2  ;;  %p43_p4 = scmp.ge.s32.totalorder %s808_s24, 2 }
   0x8   : > { %p339_p5 = scmp.lt.s32.totalorder (!%p270_p3), %s675_s18, 1  ;;  %p328_p6 = scmp.lt.s32.totalorder (!%p270_p3), %s679_s19, 1 }
   0x9   : > { %s810_s24 = smov (%p43_p4, %s808_s24), 0  ;;  %273 = sbr.rel (%p270_p3) target bundleno = 292 (0x124), region = 40 }
   0xa   : > { %s694_s13 = smov (!%p270_p3), 124   ;;  %s695_s14 = smov (!%p270_p3), 4  }
   0xe   : > { %vm374_vm0 = vcmask 64512   ;;  %v693_v0 = vmov 0.0   ;;  %s812_s18 = smov (!%p339_p5, %s675_s18), 1  ;;  %s814_s19 = smov (!%p328_p6, %s679_s19), 1  ;;  %vm382_vm1 = vcmask 261120   ;;  %vm425_vm2 = vcmask 31744  }
   0xf   : > { %375 = vst.msk [vmem:[#allocation2] sm:$0xff] %vm374_vm0, %v693_v0  ;;  %s608_s25 = sshll.u32 %s812_s18, 5  ;;  %s600_s29 = sshll.u32 %s814_s19, 3  ;;  %v427_v13 = vld [vmem:[%s798_s3] sm:$0xff] }
  0x10   : > { %s346_s28 = scalar_lea.vmem %s796_s1, %s608_s25  ;;  %s603_s30 = sshll.u32 %s814_s19, 1  ;;  %v429_v14 = vld [vmem:[%s799_s4] sm:$0xff] }
  0x11   : > { %v381_v1 = vld [vmem:[%s346_s28 + $0x18] sm:$0xff]  ;;  %v380_v2 = vld [vmem:[%s346_s28 + $0x10] sm:$0xff]  ;;  %s760_s6 = sadd.s32 %s603_s30, %s812_s18  ;;  %v379_v3 = vld [vmem:[%s346_s28 + $0x8] sm:$0xff]  ;;  %s337_s9 = scalar_lea.vmem %s795_s0, %s600_s29 }
  0x12   : > { %398 = vmatpush.msra.mxu0 %v381_v1  ;;  %v378_v4 = vld [vmem:[%s346_s28] sm:$0xff]  ;;  %s350_s12 = scalar_lea.vmem %s797_s2, %s812_s18  ;;  %s604_s19 = sshll.u32 %s760_s6, 3 }
  0x13   : > { %v377_v5 = vld [vmem:[%s337_s9] sm:$0xff]  ;;  %s369_s27 = scalar_lea.vmem %s800_s5, %s604_s19 }
  0x14   : > { %399 = vmatpush.msra.mxu0 %v380_v2  ;;  %v652_v9 = vld [vmem:[%s350_s12] ss:$0 sm:$0xff] }
  0x16   : > { %400 = vmatpush.msra.mxu0 %v379_v3  ;;  %v376_v6 = vld [vmem:[#allocation2] sm:$0xff] }
  0x18   : > { %401 = vmatpush.msra.mxu0 %v378_v4 }
  0x19   : > { %605 = vmatmul.msk.f32.vlgmr.msra.gmra.mxu0 %vm382_vm1, %v377_v5 }
  0x96   : > { %v403_v7 = vpop.f32.mrf.mxu0 }
  0x97   : > { %v406_v8 = vadd.f32 %v403_v7, %v376_v6 }
  0x99   : > { %408 = vst.msk [vmem:[#allocation2] sm:$0xff] %vm374_vm0, %v406_v8 }
  0xa0   : > { %v412_v10 = vld [vmem:[#allocation2] sm:$0xff] }
  0xa1   : > { %v417_v11 = vadd.f32 %v652_v9, %v412_v10 }
  0xa3   : > { %419 = vrot.lane.b32.xlu0 %v417_v11, %s694_s13  ;;  %v428_v17 = vmul.f32 %v427_v13, %v417_v11 }
  0xab   : > { %422 = vrot.lane.b32.xlu0 %v417_v11, %s695_s14 }
 0x115   : > { %v420_v12 = vpop.permute.xlu0 %419 }
 0x11d   : > { %v423_v15 = vpop.permute.xlu0 %422 }
 0x11e   : > { %v426_v16 = vsel %vm425_vm2, %v420_v12, %v423_v15 }
 0x11f   : > { %v430_v18 = vmul.f32 %v429_v14, %v426_v16 }
 0x121   : > { %v431_v19 = vadd.f32 %v430_v18, %v428_v17 }
 0x123   : > { %432 = vst.msk [vmem:[%s369_s27] sm:$0xff] %vm374_vm0, %v431_v19 }
 0x124 PF: > { %s15_s22 = sadd.s32 1, %s691_s22   ;;  %s801_s18 = smov %s683_s20 }
 0x125   : > { %p12_p7 = scmp.ge.s32.totalorder %s15_s22, 6   ;;  %s802_s19 = smov %s687_s21 }
 0x126   : > { %s803_s20 = smov %s806_s23  ;;  %s804_s21 = smov %s810_s24 }
 0x127   :  { %14 = sbr.rel (!%p12_p7) target bundleno = 3 (0x3), region = 90 }

// kernel: skyer_sdpa_attention.5
= control target key start
LH: loop header
LB: loop body
LE: loop exit
PB: predicated region body
PF: predicated region fallthrough
CT: control target
= control target key end

     0   :  { %s726_s18 = smov 0   ;;  %s728_s19 = smov 0   ;;  %s795_s0 = inlined_call_operand.vmem [shape: f32[2,8,32], index: 0, kind: input, shape index: {}]   ;;  %s796_s1 = inlined_call_operand.vmem [shape: f32[4,32,8], index: 1, kind: input, shape index: {}]   ;;  %s797_s2 = inlined_call_operand.vmem [shape: f32[4,1,8], index: 2, kind: input, shape index: {}]   ;;  %s798_s3 = inlined_call_operand.vmem [shape: f32[8,8], index: 3, kind: input, shape index: {}]   ;;  %s799_s4 = inlined_call_operand.vmem [shape: f32[8,8], index: 4, kind: input, shape index: {}]   ;;  %s800_s5 = inlined_call_operand.vmem [shape: f32[2,4,8,8], index: 5, kind: output, shape index: {}]  }
   0x1   :  { %s730_s20 = smov 0   ;;  %s732_s21 = smov 0  }
   0x2   :  { %s734_s22 = smov 0  }
   0x3 LB: > { %s37_s23 = sadd.s32 1, %s683_s20  ;;  %s41_s24 = sadd.s32 1, %s687_s21  ;;  %s691_s22 = sphi %s734_s22, %s15_s22   ;;  %s687_s21 = sphi %s732_s21, %s804_s21   ;;  %s683_s20 = sphi %s730_s20, %s803_s20   ;;  %s679_s19 = sphi %s728_s19, %s802_s19   ;;  %s675_s18 = sphi %s726_s18, %s801_s18  }
   0x4   : > { %p39_p0 = scmp.ge.s32.totalorder %s37_s23, 4  ;;  %p599_p1 = scmp.ge.s32.totalorder %s691_s22, 1 }
   0x5   : > { %p269_p2 = scmp.lt.s32.totalorder %s691_s22, 9 }
   0x6   : > { %s806_s23 = smov (%p39_p0, %s37_s23), 0  ;;  %s808_s24 = smov (!%p39_p0, %s41_s24), %s687_s21 }
   0x7   : > { %p270_p3 = pnand %p599_p1, %p269_p2  ;;  %p43_p4 = scmp.ge.s32.totalorder %s808_s24, 2 }
   0x8   : > { %p339_p5 = scmp.lt.s32.totalorder (!%p270_p3), %s675_s18, 3  ;;  %p328_p6 = scmp.lt.s32.totalorder (!%p270_p3), %s679_s19, 1 }
   0x9   : > { %s810_s24 = smov (%p43_p4, %s808_s24), 0  ;;  %273 = sbr.rel (%p270_p3) target bundleno = 292 (0x124), region = 40 }
   0xa   : > { %s694_s13 = smov (!%p270_p3), 124   ;;  %s695_s14 = smov (!%p270_p3), 4  }
   0xe   : > { %vm374_vm0 = vcmask 64512   ;;  %v693_v0 = vmov 0.0   ;;  %s812_s18 = smov (!%p339_p5, %s675_s18), 3  ;;  %s814_s19 = smov (!%p328_p6, %s679_s19), 1  ;;  %vm382_vm1 = vcmask 261120   ;;  %vm425_vm2 = vcmask 31744  }
   0xf   : > { %375 = vst.msk [vmem:[#allocation2] sm:$0xff] %vm374_vm0, %v693_v0  ;;  %s608_s25 = sshll.u32 %s812_s18, 5  ;;  %s600_s29 = sshll.u32 %s814_s19, 3  ;;  %v427_v13 = vld [vmem:[%s798_s3] sm:$0xff] }
  0x10   : > { %s346_s28 = scalar_lea.vmem %s796_s1, %s608_s25  ;;  %s603_s30 = sshll.u32 %s814_s19, 2  ;;  %v429_v14 = vld [vmem:[%s799_s4] sm:$0xff] }
  0x11   : > { %v381_v1 = vld [vmem:[%s346_s28 + $0x18] sm:$0xff]  ;;  %v380_v2 = vld [vmem:[%s346_s28 + $0x10] sm:$0xff]  ;;  %s760_s6 = sadd.s32 %s603_s30, %s812_s18  ;;  %v379_v3 = vld [vmem:[%s346_s28 + $0x8] sm:$0xff]  ;;  %s337_s9 = scalar_lea.vmem %s795_s0, %s600_s29 }
  0x12   : > { %398 = vmatpush.msra.mxu0 %v381_v1  ;;  %v378_v4 = vld [vmem:[%s346_s28] sm:$0xff]  ;;  %s350_s12 = scalar_lea.vmem %s797_s2, %s812_s18  ;;  %s604_s19 = sshll.u32 %s760_s6, 3 }
  0x13   : > { %v377_v5 = vld [vmem:[%s337_s9] sm:$0xff]  ;;  %s369_s27 = scalar_lea.vmem %s800_s5, %s604_s19 }
  0x14   : > { %399 = vmatpush.msra.mxu0 %v380_v2  ;;  %v652_v9 = vld [vmem:[%s350_s12] ss:$0 sm:$0xff] }
  0x16   : > { %400 = vmatpush.msra.mxu0 %v379_v3  ;;  %v376_v6 = vld [vmem:[#allocation2] sm:$0xff] }
  0x18   : > { %401 = vmatpush.msra.mxu0 %v378_v4 }
  0x19   : > { %605 = vmatmul.msk.f32.vlgmr.msra.gmra.mxu0 %vm382_vm1, %v377_v5 }
  0x96   : > { %v403_v7 = vpop.f32.mrf.mxu0 }
  0x97   : > { %v406_v8 = vadd.f32 %v403_v7, %v376_v6 }
  0x99   : > { %408 = vst.msk [vmem:[#allocation2] sm:$0xff] %vm374_vm0, %v406_v8 }
  0xa0   : > { %v412_v10 = vld [vmem:[#allocation2] sm:$0xff] }
  0xa1   : > { %v417_v11 = vadd.f32 %v652_v9, %v412_v10 }
  0xa3   : > { %419 = vrot.lane.b32.xlu0 %v417_v11, %s694_s13  ;;  %v428_v17 = vmul.f32 %v427_v13, %v417_v11 }
  0xab   : > { %422 = vrot.lane.b32.xlu0 %v417_v11, %s695_s14 }
 0x115   : > { %v420_v12 = vpop.permute.xlu0 %419 }
 0x11d   : > { %v423_v15 = vpop.permute.xlu0 %422 }
 0x11e   : > { %v426_v16 = vsel %vm425_vm2, %v420_v12, %v423_v15 }
 0x11f   : > { %v430_v18 = vmul.f32 %v429_v14, %v426_v16 }
 0x121   : > { %v431_v19 = vadd.f32 %v430_v18, %v428_v17 }
 0x123   : > { %432 = vst.msk [vmem:[%s369_s27] sm:$0xff] %vm374_vm0, %v431_v19 }
 0x124 PF: > { %s15_s22 = sadd.s32 1, %s691_s22   ;;  %s801_s18 = smov %s683_s20 }
 0x125   : > { %p12_p7 = scmp.ge.s32.totalorder %s15_s22, 10   ;;  %s802_s19 = smov %s687_s21 }
 0x126   : > { %s803_s20 = smov %s806_s23  ;;  %s804_s21 = smov %s810_s24 }
 0x127   :  { %14 = sbr.rel (!%p12_p7) target bundleno = 3 (0x3), region = 90 }

// kernel: skyer_sdpa_attention.9
= control target key start
LH: loop header
LB: loop body
LE: loop exit
PB: predicated region body
PF: predicated region fallthrough
CT: control target
= control target key end

     0   :  { %7 = vsyncpa [#allocation4], 0  ;;  %s715_s0 = inlined_call_operand.vmem [shape: f32[2,4,8,8], index: 0, kind: input, shape index: {}]   ;;  %s716_s1 = inlined_call_operand.vmem [shape: f32[4,8,32], index: 1, kind: input, shape index: {}]   ;;  %s717_s2 = inlined_call_operand.hbm [shape: f32[2,8,32], index: 2, kind: output, shape index: {}]  }
   0x1   :  { %9 = vsyncpa [#allocation4 + $0x1], 0  ;;  %s584_s9 = smov 0   ;;  %s586_s10 = smov 0  }
   0x2   :  { %s588_s11 = smov 0   ;;  %s590_s12 = smov 0  }
   0x3   :  { %s592_s13 = smov 0   ;;  %s594_s14 = smov 0  }
   0x4   :  { %s596_s15 = smov 0   ;;  %s598_s16 = smov 0  }
   0x5 LB: > { %s384_s17 = sadd.s32 4294967295, %s566_s16   ;;  %s385_s18 = sadd.s32 4294967294, %s566_s16   ;;  %s566_s16 = sphi %s598_s16, %s15_s16   ;;  %s562_s15 = sphi %s596_s15, %s726_s15   ;;  %s558_s14 = sphi %s594_s14, %s725_s14   ;;  %s554_s13 = sphi %s592_s13, %s724_s13   ;;  %s550_s12 = sphi %s590_s12, %s723_s12   ;;  %s546_s11 = sphi %s588_s11, %s722_s11   ;;  %s542_s10 = sphi %s586_s10, %s721_s10   ;;  %s538_s9 = sphi %s584_s9, %s720_s9  }
   0x6   : > { %s30_s19 = sadd.s32 1, %s558_s14  ;;  %s41_s20 = sadd.s32 1, %s562_s15 }
   0x7   : > { %p31_p0 = scmp.ge.s32.totalorder %s30_s19, 4  ;;  %p120_p1 = scmp.ne.s32.totalorder %s546_s11, %s542_s10 }
   0x8   : > { %p121_p2 = scmp.eq.s32.totalorder %s384_s17, 7  ;;  %p126_p4 = scmp.ne.s32.totalorder %s542_s10, %s538_s9 }
   0x9   : > { %s728_s19 = smov (%p31_p0, %s30_s19), 0  ;;  %s730_s20 = smov (!%p31_p0, %s41_s20), %s562_s15 }
   0xa   : > { %p633_p3 = por %p121_p2, %p120_p1  ;;  %p43_p5 = scmp.ge.s32.totalorder %s730_s20, 2 }
   0xb   : > { %p127_p6 = scmp.eq.s32.totalorder %s385_s18, 7  ;;  %p388_p7 = scmp.ge.s32.totalorder %s566_s16, 1 }
   0xc   : > { %p169_p8 = scmp.lt.s32.totalorder %s566_s16, 9  ;;  %s732_s20 = smov (%p43_p5, %s730_s20), 0 }
   0xd   : > { %p643_p9 = por %p127_p6, %p126_p4  ;;  %s103_s23 = ssub.s32 %s562_s15, %s732_s20 }
   0xe   : > { %p170_p10 = pnand %p388_p7, %p169_p8  ;;  %s110_s24 = sadd.s32 1, %s546_s11 }
   0xf   : > { %p108_p11 = scmp.eq.s32.totalorder %s103_s23, 0  ;;  %s201_s26 = sand.u32 (!%p170_p10), 1, %s542_s10  }
  0x10   : > { %173 = sbr.rel (%p170_p10) target bundleno = 184 (0xb8), region = 28  ;;  %p204_p12 = scmp.lt.s32.totalorder (!%p170_p10), %s554_s13, 1 }
  0x11   : > { %s651_s25 = scalar_select %p108_p11, %s546_s11, %s110_s24  }
  0x12   : > { %s657_s27 = sshll.u32 (!%p170_p10), %s201_s26, 3  ;;  %p206_p13 = scmp.lt.s32.totalorder (!%p170_p10), %s550_s12, 3 }
  0x13   : > { %s203_s24 = scalar_lea.vmem (!%p170_p10), [#allocation3], %s657_s27  ;;  %p393_p0 = scmp.ne.s32.totalorder (!%p170_p10), %s550_s12, 0 }
  0x15   : > { %s205_s28 = scalar_select %p204_p12, %s554_s13, 1 }
  0x16   : > { %s207_s29 = scalar_select %p206_p13, %s550_s12, 3 }
  0x17   : > { %s390_s30 = sshll.u32 %s205_s28, 2  ;;  %225 = sbr.rel (%p393_p0) target bundleno = 30 (0x1e), region = 32 }
  0x18   : > { %s212_s3 = sadd.s32 %s390_s30, %s207_s29  ;;  %s392_s4 = sshll.u32 %s207_s29, 3 }
  0x19   : > { %s391_s5 = sshll.u32 %s212_s3, 3  ;;  %s221_s8 = scalar_lea.vmem %s716_s1, %s392_s4 }
  0x1a   : > { %s214_s23 = scalar_lea.vmem %s715_s0, %s391_s5 }
  0x1c   : > { %vm226_vm0 = vcmask 261120   ;;  %v568_v0 = vmov 0.0  }
  0x1d   : > { %227 = vst.msk [vmem:[#allocation2] sm:$0xff] %vm226_vm0, %v568_v0 }
  0x1e PF: > { %v230_v1 = vld [vmem:[%s221_s8] sm:$0xff]  ;;  %vm231_vm1 = vcmask 64512   ;;  %vm256_vm2 = vcmask 261120   ;;  %p395_p1 = scmp.ne.s32.totalorder %s550_s12, 3 }
  0x1f   : > { %v229_v2 = vld [vmem:[%s214_s23] sm:$0xff]  ;;  %250 = vmatpush.msra.mxu0 %v230_v1 }
  0x20   : > { %394 = vmatmul.msk.f32.vlgmr.msra.gmra.mxu0 %vm231_vm1, %v229_v2 }
  0x24   : > { %v228_v3 = vld [vmem:[#allocation2] sm:$0xff] }
  0x9c   : > { %261 = sbr.rel (%p395_p1) target bundleno = 169 (0xa9), region = 36 }
  0x9d   : > { %v252_v4 = vpop.f32.mrf.mxu0 }
  0x9e   : > { %v255_v5 = vadd.f32 %v252_v4, %v228_v3 }
  0xa0   : > { %257 = vst.msk [vmem:[#allocation2] sm:$0xff] %vm256_vm2, %v255_v5 }
  0xa7   : > { %v262_v6 = vld [vmem:[#allocation2] sm:$0xff] }
  0xa8   : > { %263 = vst.msk [vmem:[%s203_s24] sm:$0xff] %vm256_vm2, %v262_v6 }
  0xa9 PF: > { %s397_s27 = sshll.u32 %s554_s13, 3  ;;  %s279_s3 = sshll.u32 %s203_s24, 4  ;;  %s280_s3 = int_to_ptr.vmem [resolvable:$true] %s279_s3 }
  0xaa   : > { %s277_s30 = scalar_lea.hbm %s717_s2, %s397_s27  ;;  %s265_s5 = scalar_lea.sflag [#allocation4], %s201_s26 }
  0xab   : > { %s281_s4 = sshll.u32 %s277_s30, 4  ;;  %s492_s13 = scalar_lea.hbm %s717_s2, 16  ;;  %s282_s4 = int_to_ptr.hbm [resolvable:$true] %s281_s4 }
  0xac   : > { %s486_s6 = sshra.s32 %s282_s4, 4  ;;  %s487_s6 = int_to_ptr.hbm [resolvable:$true] %s486_s6 }
  0xad   : > { %s488_s12 = scalar_lea.hbm %s487_s6, 8  ;;  %p493_p6 = scmp.lt.s32.totalorder %s487_s6, %s717_s2 }
  0xae   : > { %p489_p2 = scmp.ne.s32.totalorder %s487_s6, %s488_s12  ;;  %p494_p7 = scmp.lt.s32.totalorder %s492_s13, %s488_s12 }
  0xb0   : > { %p490_p4 = pnand %p489_p2, %p633_p3  ;;  %p495_p8 = por %p494_p7, %p493_p6 }
  0xb2   : > { %p491_p5 = pneg %p490_p4 }
  0xb4   : > { %p496_p10 = pnand %p495_p8, %p491_p5 }
  0xb6   : > { %499 = shalt.err (!%p496_p10)
}
  0xb7   : > { %400 = dma.vmem_to_hbm [thread:$0]  (%p633_p3), %s280_s3, 128, %s282_s4, %s265_s5  }
  0xb8 PF: > { %p406_p11 = scmp.ge.s32.totalorder %s566_s16, 2  ;;  %s293_s26 = sand.u32 1, %s538_s9  }
  0xb9   : > { %s294_s23 = scalar_lea.sflag [#allocation4], %s293_s26 }
  0xba   : > { %p403_p12 = pnand %p406_p11, %p643_p9 }
  0xbc   : > { %p404_p13 = pneg %p403_p12 }
  0xbe   : > { %533 = dma.done.wait (%p404_p13), %s294_s23, 128  }
  0xbf   : > { %535 = vsyncadd (%p404_p13), %s294_s23, 4294967168  ;;  %s15_s16 = sadd.s32 1, %s566_s16   ;;  %s720_s9 = smov %s542_s10 }
  0xc0   : > { %p12_p0 = scmp.ge.s32.totalorder %s15_s16, 10   ;;  %s721_s10 = smov %s546_s11 }
  0xc1   : > { %s722_s11 = smov %s651_s25  ;;  %s723_s12 = smov %s558_s14 }
  0xc2   : > { %s724_s13 = smov %s562_s15  ;;  %s725_s14 = smov %s728_s19 }
  0xc3   : > { %s726_s15 = smov %s732_s20  ;;  %14 = sbr.rel (!%p12_p0) target bundleno = 5 (0x5), region = 74 }
  0xc8   :  { %300 = vsyncpa [#allocation4], 1 }
  0xc9   :  { %302 = vsyncpa [#allocation4 + $0x1], 1 }

</bundles_post_ra>
